<compile_context>
chip_gen: v6e
topology: v6e:2x2x1
jax: 0.10.0
libtpu: 0.0.40
codegen_flags: <defaults>
</compile_context>

<pallas_src>
import jax
import jax.numpy as jnp
from jax.experimental import pallas as pl
from jax.experimental.pallas import tpu as pltpu

_IN = 640
_LANE = 128

# Packed weight-slab row layout (single (1920, 512) bf16 slab):
#   rows    0: 640, cols 0:512 -> merged acc/ori commonDense1   (acc cols 0:256 | ori 256:512)
#   rows  640:1152, cols 0:128 -> merged sigma heads (pre-ReLU common) -> lanes 1, 3
#   rows 1152:1664, cols 0:256 -> acc_meanDense2 (lane 0) + ori_meanDense2 (cols 128:256)
#   rows 1664:1792, cols 0:128 -> ori_meanDense3 (128 -> 32, cols 0:32)
#   rows 1792:1920, cols 0:128 -> ori_meanDense4 (32 -> 1, lane 2)
_W_ROWS = 1920
_W_COLS = 512


def _round_up(x, m):
    return (x + m - 1) // m * m


# ---------------------------------------------------------------------------
# Single fused kernel: the whole Actor_builder forward pass.
# ---------------------------------------------------------------------------
def _actor_kernel(x_ref, w_ref, b_ref, o_ref):
    x = x_ref[...]                                        # (TM, 640) bf16
    b = b_ref[...]                                        # (8, 512)  f32

    def dense(a, w, bias):
        return jnp.dot(a, w, preferred_element_type=jnp.float32) + bias

    # ---- merged common layers: acc cols 0:256, ori cols 256:512 ----
    r = dense(x, w_ref[0:640, :], b[0:1, :])              # (TM, 512) f32
    r_bf = r.astype(jnp.bfloat16)

    # ---- merged sigma heads (PyTorch feeds the PRE-ReLU common) -> lanes 1, 3 ----
    z_sigma = dense(r_bf, w_ref[640:1152, 0:128], b[1:2, 0:128])      # (TM, 128)

    # ---- ReLU'd common -> acc-mean head (lane 0) + ori_meanDense2 (cols 128:256) ----
    h = jnp.maximum(r, 0.0).astype(jnp.bfloat16)
    mid = dense(h, w_ref[1152:1664, 0:256], b[2:3, 0:256])            # (TM, 256)
    z_acc_mean = mid[:, 0:128]                                        # lane 0 real, rest 0
    h2 = jnp.maximum(mid[:, 128:256], 0.0).astype(jnp.bfloat16)

    # ---- ori_meanDense3 + ReLU (real lanes 0:32, rest exact 0) ----
    h3 = jnp.maximum(dense(h2, w_ref[1664:1792, 0:128], b[3:4, 0:128]), 0.0)
    h3 = h3.astype(jnp.bfloat16)

    # ---- ori_meanDense4 -> lane 2 ----
    z_om4 = dense(h3, w_ref[1792:1920, 0:128], b[4:5, 0:128])         # (TM, 128)

    # Heads occupy disjoint lanes 0..3 with exact zeros elsewhere: one add-chain,
    # each non-linearity applied once, single lane-based select, one unmasked store.
    z = z_acc_mean + z_sigma + z_om4                                  # (TM, 128)
    lane = jax.lax.broadcasted_iota(jnp.int32, z.shape, 1)

    sig = jnp.clip(pl.reciprocal(1.0 + jnp.exp(-z), approx=True), 0.0, 1.0)
    sp = jnp.maximum(z, 0.0) + jnp.log(1.0 + jnp.exp(-jnp.abs(z)))    # stable softplus
    th = jnp.tanh(z)

    out = jnp.where(lane == 0, sig,
          jnp.where(lane == 2, th,
          jnp.where((lane == 1) | (lane == 3), sp, 0.0)))
    o_ref[...] = out


# ---------------------------------------------------------------------------
# Parameter init (PyTorch nn.Linear default init, (out, in) layout) + one-time packing.
# ---------------------------------------------------------------------------
def init_raw_params(key):
    def linear(k, out_f, in_f):
        k1, k2 = jax.random.split(k)
        bound = 1.0 / float(in_f) ** 0.5
        w = jax.random.uniform(k1, (out_f, in_f), jnp.float32, -bound, bound)
        b = jax.random.uniform(k2, (out_f,), jnp.float32, -bound, bound)
        return w, b

    ks = jax.random.split(key, 8)
    return {
        "acc_commonDense1": linear(ks[0], 256, 640),
        "acc_meanDense2":   linear(ks[1], 1, 256),
        "acc_sigmaDense1":  linear(ks[2], 1, 256),
        "ori_commonDense1": linear(ks[3], 256, 640),
        "ori_meanDense2":   linear(ks[4], 128, 256),
        "ori_meanDense3":   linear(ks[5], 32, 128),
        "ori_meanDense4":   linear(ks[6], 1, 32),
        "ori_sigmaDense1":  linear(ks[7], 1, 256),
    }


def pack_params(raw):
    """Pack all 8 Linear layers into one bf16 weight slab + one f32 bias slab."""
    W = jnp.zeros((_W_ROWS, _W_COLS), jnp.float32)
    Bv = jnp.zeros((8, _W_COLS), jnp.float32)

    def wT(name):                                     # (out,in) -> (in,out) GEMM layout
        return jnp.asarray(raw[name][0], jnp.float32).T

    def bias(name):
        return jnp.asarray(raw[name][1], jnp.float32)

    # block 0: merged common layers
    W = W.at[0:640, 0:256].set(wT("acc_commonDense1"))
    W = W.at[0:640, 256:512].set(wT("ori_commonDense1"))
    Bv = Bv.at[0, 0:256].set(bias("acc_commonDense1"))
    Bv = Bv.at[0, 256:512].set(bias("ori_commonDense1"))

    # block 1: merged sigma heads (inputs = combined pre-ReLU common)
    W = W.at[640:896, 1:2].set(wT("acc_sigmaDense1"))          # lane 1
    W = W.at[896:1152, 3:4].set(wT("ori_sigmaDense1"))         # lane 3
    Bv = Bv.at[1, 1].set(bias("acc_sigmaDense1")[0])
    Bv = Bv.at[1, 3].set(bias("ori_sigmaDense1")[0])

    # block 2: acc_meanDense2 (lane 0) + ori_meanDense2 (cols 128:256)
    W = W.at[1152:1408, 0:1].set(wT("acc_meanDense2"))
    W = W.at[1408:1664, 128:256].set(wT("ori_meanDense2"))
    Bv = Bv.at[2, 0].set(bias("acc_meanDense2")[0])
    Bv = Bv.at[2, 128:256].set(bias("ori_meanDense2"))

    # block 3: ori_meanDense3 (128 -> 32)
    W = W.at[1664:1792, 0:32].set(wT("ori_meanDense3"))
    Bv = Bv.at[3, 0:32].set(bias("ori_meanDense3"))

    # block 4: ori_meanDense4 (32 -> 1) -> lane 2
    W = W.at[1792:1824, 2:3].set(wT("ori_meanDense4"))
    Bv = Bv.at[4, 2].set(bias("ori_meanDense4")[0])

    return {"w_slab": W.astype(jnp.bfloat16), "b_slab": Bv}


# ---------------------------------------------------------------------------
# Forward pass == Actor_builder.forward(common)
# ---------------------------------------------------------------------------
@jax.jit
def actor_forward(packed, common):
    B = common.shape[0]
    # Batch tile: one tile for small batches; cap at 256 rows (safe for v7x's 64 MiB VMEM).
    TM = 256 if B > 256 else _round_up(max(B, 1), 16)
    Bp = _round_up(B, TM)

    x_bf = common.astype(jnp.bfloat16)
    if Bp == B:
        x_p = x_bf                                     # no padded copy when tile-aligned
    else:
        x_p = jnp.zeros((Bp, _IN), jnp.bfloat16).at[:B, :].set(x_bf)

    out = pl.pallas_call(
        _actor_kernel,
        out_shape=jax.ShapeDtypeStruct((Bp, _LANE), jnp.float32),
        grid=(Bp // TM,),
        in_specs=[
            pl.BlockSpec((TM, _IN), lambda i: (i, 0)),              # x: batch-tiled
            pl.BlockSpec((_W_ROWS, _W_COLS), lambda i: (0, 0)),     # weights: resident
            pl.BlockSpec((8, _W_COLS), lambda i: (0, 0)),           # biases: resident
        ],
        out_specs=pl.BlockSpec((TM, _LANE), lambda i: (i, 0)),
        compiler_params=pltpu.CompilerParams(
            dimension_semantics=("parallel",),       # batch tiles split across v7x's 2 TCs
            vmem_limit_bytes=32 << 20,               # need ~4 MiB; safe on v5e/v6e/v7x
        ),
    )(x_p, packed["w_slab"], packed["b_slab"])

    acc_mean = out[:B, 0:1]
    acc_sigma = out[:B, 1:2]
    ori_mean = out[:B, 2:3]
    ori_sigma = out[:B, 3:4]
    return (acc_mean, acc_sigma), (ori_mean, ori_sigma)


# ---------------------------------------------------------------------------
# Pure-JAX reference (replicates the kernel's bf16-operand / f32-accumulate pipeline).
# ---------------------------------------------------------------------------
def _ref_forward(raw, common):
    f32 = jnp.float32

    def bf(a):
        return jnp.asarray(a, f32).astype(jnp.bfloat16).astype(f32)

    def dense(x, name):
        w, b = raw[name]
        return jnp.dot(bf(x), bf(jnp.asarray(w, f32).T),
                       preferred_element_type=f32) + jnp.asarray(b, f32)

    x = jnp.asarray(common, f32)
    acc_common = dense(x, "acc_commonDense1")
    acc_mean = jax.nn.sigmoid(dense(jnp.maximum(acc_common, 0.0), "acc_meanDense2"))
    acc_sigma = jax.nn.softplus(dense(acc_common, "acc_sigmaDense1"))
    ori_common = dense(x, "ori_commonDense1")
    h = jnp.maximum(ori_common, 0.0)
    h = jnp.maximum(dense(h, "ori_meanDense2"), 0.0)
    h = jnp.maximum(dense(h, "ori_meanDense3"), 0.0)
    ori_mean = jnp.tanh(dense(h, "ori_meanDense4"))
    ori_sigma = jax.nn.softplus(dense(ori_common, "ori_sigmaDense1"))
    return (acc_mean, acc_sigma), (ori_mean, ori_sigma)


if __name__ == "__main__":
    key = jax.random.PRNGKey(0)
    k_param, k_in = jax.random.split(key)

    raw = init_raw_params(k_param)
    packed = pack_params(raw)          # one-time packing, outside the hot path

    batch = 2
    common = jax.random.normal(k_in, (batch, _IN), jnp.float32)

    (acc_mean, acc_sigma), (ori_mean, ori_sigma) = actor_forward(packed, common)
    jax.block_until_ready((acc_mean, acc_sigma, ori_mean, ori_sigma))

    # shape / range sanity
    for t in (acc_mean, acc_sigma, ori_mean, ori_sigma):
        assert t.shape == (batch, 1), t.shape
        assert bool(jnp.all(jnp.isfinite(t)))
    assert bool(jnp.all((acc_mean >= 0.0) & (acc_mean <= 1.0)))     # sigmoid range
    assert bool(jnp.all(jnp.abs(ori_mean) <= 1.0))                  # tanh range
    assert bool(jnp.all(acc_sigma >= 0.0)) and bool(jnp.all(ori_sigma >= 0.0))

    # numerical check against a pure-JAX reference of the original module
    (ram, ras), (rom, ros) = _ref_forward(raw, common)
    for got, ref in ((acc_mean, ram), (acc_sigma, ras),
                     (ori_mean, rom), (ori_sigma, ros)):
        assert bool(jnp.allclose(got, ref, atol=2e-2, rtol=2e-2)), (got, ref)

    print("KERNEL_OK")
</pallas_src>

<mosaic_0001>
module attributes {stable_mosaic.version = 11 : i64} {
  func.func @_actor_kernel(%arg0: i32, %arg1: memref<16x640xbf16, #tpu.memory_space<vmem>>, %arg2: memref<1920x512xbf16, #tpu.memory_space<vmem>>, %arg3: memref<8x512xf32, #tpu.memory_space<vmem>>, %arg4: memref<16x128xf32, #tpu.memory_space<vmem>>) attributes {dimension_semantics = [#tpu.dimension_semantics<parallel>], iteration_bounds = array<i64: 1>, scalar_prefetch = 0 : i64, scratch_operands = 0 : i64, tpu.core_type = #tpu.core_type<tc>, window_params = [{transform_indices = @transform_0, window_bounds = array<i64: 16, 640>}, {pipeline_mode = #tpu.pipeline_mode<synchronous>, transform_indices = @transform_1, window_bounds = array<i64: 1920, 512>}, {pipeline_mode = #tpu.pipeline_mode<synchronous>, transform_indices = @transform_2, window_bounds = array<i64: 8, 512>}, {transform_indices = @transform_3, window_bounds = array<i64: 16, 128>}]} {
    %c0 = arith.constant 0 : index
    %c0_0 = arith.constant 0 : index
    %0 = vector.load %arg1[%c0, %c0_0] : memref<16x640xbf16, #tpu.memory_space<vmem>>, vector<16x640xbf16>
    %c0_1 = arith.constant 0 : index
    %c0_2 = arith.constant 0 : index
    %1 = vector.load %arg3[%c0_1, %c0_2] : memref<8x512xf32, #tpu.memory_space<vmem>>, vector<8x512xf32>
    %c0_3 = arith.constant 0 : index
    %c0_4 = arith.constant 0 : index
    %2 = vector.load %arg2[%c0_3, %c0_4] : memref<1920x512xbf16, #tpu.memory_space<vmem>>, vector<640x512xbf16>
    %3 = vector.extract_strided_slice %1 {offsets = [0, 0], sizes = [1, 512], strides = [1, 1]} : vector<8x512xf32> to vector<1x512xf32>
    %cst = arith.constant dense<0.000000e+00> : vector<16x512xf32>
    %4 = tpu.matmul %0, %2, %cst {dimension_numbers = #tpu.dot_dimension_numbers<[1], [0], [0], [1], [0, 0, 1, 1], [], []>} : vector<16x640xbf16>, vector<640x512xbf16>, vector<16x512xf32> -> vector<16x512xf32>
    %5 = vector.broadcast %3 : vector<1x512xf32> to vector<16x512xf32>
    %6 = arith.addf %4, %5 : vector<16x512xf32>
    %7 = arith.truncf %6 : vector<16x512xf32> to vector<16x512xbf16>
    %c640 = arith.constant 640 : index
    %c0_5 = arith.constant 0 : index
    %8 = vector.load %arg2[%c640, %c0_5] : memref<1920x512xbf16, #tpu.memory_space<vmem>>, vector<512x128xbf16>
    %9 = vector.extract_strided_slice %1 {offsets = [1, 0], sizes = [1, 128], strides = [1, 1]} : vector<8x512xf32> to vector<1x128xf32>
    %cst_6 = arith.constant dense<0.000000e+00> : vector<16x128xf32>
    %10 = tpu.matmul %7, %8, %cst_6 {dimension_numbers = #tpu.dot_dimension_numbers<[1], [0], [0], [1], [0, 0, 1, 1], [], []>} : vector<16x512xbf16>, vector<512x128xbf16>, vector<16x128xf32> -> vector<16x128xf32>
    %11 = vector.broadcast %9 : vector<1x128xf32> to vector<16x128xf32>
    %12 = arith.addf %10, %11 : vector<16x128xf32>
    %cst_7 = arith.constant 0.000000e+00 : f32
    %13 = vector.broadcast %cst_7 : f32 to vector<16x512xf32>
    %14 = arith.maximumf %6, %13 : vector<16x512xf32>
    %15 = arith.truncf %14 : vector<16x512xf32> to vector<16x512xbf16>
    %c1152 = arith.constant 1152 : index
    %c0_8 = arith.constant 0 : index
    %16 = vector.load %arg2[%c1152, %c0_8] : memref<1920x512xbf16, #tpu.memory_space<vmem>>, vector<512x256xbf16>
    %17 = vector.extract_strided_slice %1 {offsets = [2, 0], sizes = [1, 256], strides = [1, 1]} : vector<8x512xf32> to vector<1x256xf32>
    %cst_9 = arith.constant dense<0.000000e+00> : vector<16x256xf32>
    %18 = tpu.matmul %15, %16, %cst_9 {dimension_numbers = #tpu.dot_dimension_numbers<[1], [0], [0], [1], [0, 0, 1, 1], [], []>} : vector<16x512xbf16>, vector<512x256xbf16>, vector<16x256xf32> -> vector<16x256xf32>
    %19 = vector.broadcast %17 : vector<1x256xf32> to vector<16x256xf32>
    %20 = arith.addf %18, %19 : vector<16x256xf32>
    %21 = vector.extract_strided_slice %20 {offsets = [0, 0], sizes = [16, 128], strides = [1, 1]} : vector<16x256xf32> to vector<16x128xf32>
    %22 = vector.extract_strided_slice %20 {offsets = [0, 128], sizes = [16, 128], strides = [1, 1]} : vector<16x256xf32> to vector<16x128xf32>
    %cst_10 = arith.constant 0.000000e+00 : f32
    %23 = vector.broadcast %cst_10 : f32 to vector<16x128xf32>
    %24 = arith.maximumf %22, %23 : vector<16x128xf32>
    %25 = arith.truncf %24 : vector<16x128xf32> to vector<16x128xbf16>
    %c1664 = arith.constant 1664 : index
    %c0_11 = arith.constant 0 : index
    %26 = vector.load %arg2[%c1664, %c0_11] : memref<1920x512xbf16, #tpu.memory_space<vmem>>, vector<128x128xbf16>
    %27 = vector.extract_strided_slice %1 {offsets = [3, 0], sizes = [1, 128], strides = [1, 1]} : vector<8x512xf32> to vector<1x128xf32>
    %cst_12 = arith.constant dense<0.000000e+00> : vector<16x128xf32>
    %28 = tpu.matmul %25, %26, %cst_12 {dimension_numbers = #tpu.dot_dimension_numbers<[1], [0], [0], [1], [0, 0, 1, 1], [], []>} : vector<16x128xbf16>, vector<128x128xbf16>, vector<16x128xf32> -> vector<16x128xf32>
    %29 = vector.broadcast %27 : vector<1x128xf32> to vector<16x128xf32>
    %30 = arith.addf %28, %29 : vector<16x128xf32>
    %cst_13 = arith.constant 0.000000e+00 : f32
    %31 = vector.broadcast %cst_13 : f32 to vector<16x128xf32>
    %32 = arith.maximumf %30, %31 : vector<16x128xf32>
    %33 = arith.truncf %32 : vector<16x128xf32> to vector<16x128xbf16>
    %c1792 = arith.constant 1792 : index
    %c0_14 = arith.constant 0 : index
    %34 = vector.load %arg2[%c1792, %c0_14] : memref<1920x512xbf16, #tpu.memory_space<vmem>>, vector<128x128xbf16>
    %35 = vector.extract_strided_slice %1 {offsets = [4, 0], sizes = [1, 128], strides = [1, 1]} : vector<8x512xf32> to vector<1x128xf32>
    %cst_15 = arith.constant dense<0.000000e+00> : vector<16x128xf32>
    %36 = tpu.matmul %33, %34, %cst_15 {dimension_numbers = #tpu.dot_dimension_numbers<[1], [0], [0], [1], [0, 0, 1, 1], [], []>} : vector<16x128xbf16>, vector<128x128xbf16>, vector<16x128xf32> -> vector<16x128xf32>
    %37 = vector.broadcast %35 : vector<1x128xf32> to vector<16x128xf32>
    %38 = arith.addf %36, %37 : vector<16x128xf32>
    %39 = arith.addf %21, %12 : vector<16x128xf32>
    %40 = arith.addf %39, %38 : vector<16x128xf32>
    %41 = tpu.iota {dimensions = array<i32: 1>} : vector<16x128xi32>
    %cst_16 = arith.constant 0.000000e+00 : f32
    %42 = vector.broadcast %cst_16 : f32 to vector<16x128xf32>
    %43 = arith.subf %42, %40 : vector<16x128xf32>
    %44 = math.exp %43 : vector<16x128xf32>
    %cst_17 = arith.constant 1.000000e+00 : f32
    %45 = vector.broadcast %cst_17 : f32 to vector<16x128xf32>
    %46 = arith.addf %45, %44 : vector<16x128xf32>
    %47 = tpu.reciprocal %46 {approx = true} : vector<16x128xf32> -> vector<16x128xf32>
    %cst_18 = arith.constant 0.000000e+00 : f32
    %cst_19 = arith.constant 1.000000e+00 : f32
    %48 = vector.broadcast %cst_18 : f32 to vector<16x128xf32>
    %49 = arith.maximumf %48, %47 : vector<16x128xf32>
    %50 = vector.broadcast %cst_19 : f32 to vector<16x128xf32>
    %51 = arith.minimumf %50, %49 : vector<16x128xf32>
    %cst_20 = arith.constant 0.000000e+00 : f32
    %52 = vector.broadcast %cst_20 : f32 to vector<16x128xf32>
    %53 = arith.maximumf %40, %52 : vector<16x128xf32>
    %54 = math.absf %40 : vector<16x128xf32>
    %cst_21 = arith.constant 0.000000e+00 : f32
    %55 = vector.broadcast %cst_21 : f32 to vector<16x128xf32>
    %56 = arith.subf %55, %54 : vector<16x128xf32>
    %57 = math.exp %56 : vector<16x128xf32>
    %cst_22 = arith.constant 1.000000e+00 : f32
    %58 = vector.broadcast %cst_22 : f32 to vector<16x128xf32>
    %59 = arith.addf %58, %57 : vector<16x128xf32>
    %60 = math.log %59 : vector<16x128xf32>
    %61 = arith.addf %53, %60 : vector<16x128xf32>
    %62 = math.tanh %40 : vector<16x128xf32>
    %c0_i32 = arith.constant 0 : i32
    %63 = vector.broadcast %c0_i32 : i32 to vector<16x128xi32>
    %64 = arith.cmpi eq, %41, %63 : vector<16x128xi32>
    %c2_i32 = arith.constant 2 : i32
    %65 = vector.broadcast %c2_i32 : i32 to vector<16x128xi32>
    %66 = arith.cmpi eq, %41, %65 : vector<16x128xi32>
    %c1_i32 = arith.constant 1 : i32
    %67 = vector.broadcast %c1_i32 : i32 to vector<16x128xi32>
    %68 = arith.cmpi eq, %41, %67 : vector<16x128xi32>
    %c3_i32 = arith.constant 3 : i32
    %69 = vector.broadcast %c3_i32 : i32 to vector<16x128xi32>
    %70 = arith.cmpi eq, %41, %69 : vector<16x128xi32>
    %71 = arith.ori %68, %70 : vector<16x128xi1>
    %cst_23 = arith.constant 0.000000e+00 : f32
    %72 = vector.broadcast %cst_23 : f32 to vector<16x128xf32>
    %73 = arith.select %71, %61, %72 : vector<16x128xi1>, vector<16x128xf32>
    %74 = arith.select %66, %62, %73 : vector<16x128xi1>, vector<16x128xf32>
    %75 = arith.select %64, %51, %74 : vector<16x128xi1>, vector<16x128xf32>
    %c0_24 = arith.constant 0 : index
    %c0_25 = arith.constant 0 : index
    %76 = vector.load %arg4[%c0_24, %c0_25] : memref<16x128xf32, #tpu.memory_space<vmem>>, vector<16x128xf32>
    tpu.vector_store %arg4[%c0_24, %c0_25], %75 {strides = array<i32>} : memref<16x128xf32, #tpu.memory_space<vmem>>, vector<16x128xf32>,
    return
  }
  func.func @transform_0(%arg0: i32) -> (i32, i32) {
    %c0_i32 = arith.constant 0 : i32
    %c0_i32_0 = arith.constant 0 : i32
    return %arg0, %c0_i32 : i32, i32
  }
  func.func @transform_1(%arg0: i32) -> (i32, i32) {
    %c0_i32 = arith.constant 0 : i32
    %c0_i32_0 = arith.constant 0 : i32
    %c0_i32_1 = arith.constant 0 : i32
    return %c0_i32, %c0_i32_0 : i32, i32
  }
  func.func @transform_2(%arg0: i32) -> (i32, i32) {
    %c0_i32 = arith.constant 0 : i32
    %c0_i32_0 = arith.constant 0 : i32
    %c0_i32_1 = arith.constant 0 : i32
    return %c0_i32, %c0_i32_0 : i32, i32
  }
  func.func @transform_3(%arg0: i32) -> (i32, i32) {
    %c0_i32 = arith.constant 0 : i32
    %c0_i32_0 = arith.constant 0 : i32
    return %arg0, %c0_i32 : i32, i32
  }
}

</mosaic_0001>

<bundles_post_ra>
// kernel: actor_forward.1
= control target key start
LH: loop header
LB: loop body
LE: loop exit
PB: predicated region body
PF: predicated region fallthrough
CT: control target
= control target key end

     0   :  { %8 = vsyncpa [#allocation3], 0  ;;  %s3413_s0 = inlined_call_operand.vmem [shape: bf16[16,640], index: 0, kind: input, shape index: {}]   ;;  %s3414_s1 = inlined_call_operand.hbm [shape: bf16[1920,512], index: 1, kind: input, shape index: {}]   ;;  %s3415_s2 = inlined_call_operand.hbm [shape: f32[8,512], index: 2, kind: input, shape index: {}]   ;;  %s3416_s3 = inlined_call_operand.vmem [shape: f32[16,128], index: 3, kind: output, shape index: {}]  }
   0x1   :  { %9 = vsyncpa [#allocation5], 0  ;;  %s3271_s12 = smov [#allocation2]  }
   0x2   :  { %s17_s13 = sshll.u32 %s3271_s12, 4  ;;  %s18_s13 = int_to_ptr.vmem [resolvable:$true] %s17_s13 }
   0x3   :  { %s3235_s14 = scalar_lea.vmem %s18_s13, 61440  ;;  %p3240_p1 = scmp.lt.s32.totalorder %s18_s13, %s18_s13 }
   0x4   :  { %p3236_p0 = scmp.ne.s32.totalorder %s18_s13, %s3235_s14  ;;  %p3241_p2 = scmp.lt.s32.totalorder %s3235_s14, %s3235_s14 }
   0x6   :  { %p3242_p3 = por %p3241_p2, %p3240_p1 }
   0x8   :  { %p3243_p4 = pnand %p3242_p3, %p3236_p0 }
   0xa   :  { %3246 = shalt.err (!%p3243_p4)
}
   0xb   :  { %s3272_s15 = smov 256   ;;  %s3273_s16 = smov 16  }
   0xc   :  { %23 = dma.hbm_to_vmem [thread:$0]  %s3414_s1, 61440, %s18_s13, [#allocation3], %s3272_s15, %s3272_s15, %s3273_s16  }
   0xd   :  { %s3274_s19 = smov [#allocation4]  }
   0xe   :  { %s30_s20 = sshll.u32 %s3274_s19, 4  ;;  %s31_s20 = int_to_ptr.vmem [resolvable:$true] %s30_s20 }
   0xf   :  { %s3255_s21 = scalar_lea.vmem %s31_s20, 512  ;;  %p3260_p6 = scmp.lt.s32.totalorder %s31_s20, %s31_s20 }
  0x10   :  { %p3256_p5 = scmp.ne.s32.totalorder %s31_s20, %s3255_s21  ;;  %p3261_p7 = scmp.lt.s32.totalorder %s3255_s21, %s3255_s21 }
  0x12   :  { %p3262_p8 = por %p3261_p7, %p3260_p6 }
  0x14   :  { %p3263_p9 = pnand %p3262_p8, %p3256_p5 }
  0x16   :  { %3266 = shalt.err (!%p3263_p9)
}
  0x17   :  { %33 = dma.hbm_to_vmem [thread:$0]  %s3415_s2, 512, %s31_s20, [#allocation5]  }
  0x18   :  { %3267 = dma.done.wait [#allocation3], 61440  }
  0x19   :  { %3268 = vsyncadd [#allocation3], 4294905856 }
  0x1a   :  { %3269 = dma.done.wait [#allocation5], 512  }
  0x1b   :  { %3270 = vsyncadd [#allocation5], 4294966784  ;;  %v2816_v0 = vld [vmem:[#allocation2 + $0xe4] ss:$16 sps:$4 sm:$0xff]   ;;  %v2820_v2 = vld [vmem:[#allocation2 + $0xe0] ss:$16 sps:$4 sm:$0xff]  }
  0x1c   :  { %v2818_v1 = vld [vmem:[#allocation2 + $0x2e4] ss:$16 sps:$4 sm:$0xff]   ;;  %1053 = vmatprep.subr.bf16.mxu0 %v2816_v0  ;;  %v2821_v3 = vld [vmem:[#allocation2 + $0x2e0] ss:$16 sps:$4 sm:$0xff]   ;;  %vm3277_vm0 = vmmov 0  }
  0x1d   :  { %1096 = vmatprep.subr.bf16.mxu1 %v2818_v1  ;;  %v2822_v4 = vld [vmem:[#allocation2 + $0xc4] ss:$16 sps:$4 sm:$0xff]   ;;  %1054 = vmatpush1.bf16.msra.mxu0 %v2820_v2  ;;  %v2826_v6 = vld [vmem:[#allocation2 + $0xc0] ss:$16 sps:$4 sm:$0xff]  }
  0x1e   :  { %1097 = vmatpush1.bf16.msra.mxu1 %v2821_v3  ;;  %v2824_v5 = vld [vmem:[#allocation2 + $0x2c4] ss:$16 sps:$4 sm:$0xff]   ;;  %1055 = vmatprep.subr.bf16.mxu0 %v2822_v4  ;;  %v2827_v7 = vld [vmem:[#allocation2 + $0x2c0] ss:$16 sps:$4 sm:$0xff]   ;;  %v2923_v3 = vld [vmem:[#allocation2 + $0xec] ss:$16 sps:$4 sm:$0xff]  }
  0x1f   :  { %1098 = vmatprep.subr.bf16.mxu1 %v2824_v5  ;;  %v2828_v8 = vld [vmem:[#allocation2 + $0xa4] ss:$16 sps:$4 sm:$0xff]   ;;  %v2832_v10 = vld [vmem:[#allocation2 + $0xa0] ss:$16 sps:$4 sm:$0xff]   ;;  %v3321_v5 = vld [vmem:[%s3413_s0 + $0x8] ss:$20 sps:$4 sm:$0xff]  }
  0x20   :  { %v2830_v9 = vld [vmem:[#allocation2 + $0x2a4] ss:$16 sps:$4 sm:$0xff]   ;;  %v2833_v11 = vld [vmem:[#allocation2 + $0x2a0] ss:$16 sps:$4 sm:$0xff]  }
  0x21   :  { %1056 = vmatpush1.bf16.msra.mxu0 %v2826_v6  ;;  %v2834_v12 = vld [vmem:[#allocation2 + $0x84] ss:$16 sps:$4 sm:$0xff]   ;;  %v2838_v14 = vld [vmem:[#allocation2 + $0x80] ss:$16 sps:$4 sm:$0xff]  }
  0x22   :  { %1099 = vmatpush1.bf16.msra.mxu1 %v2827_v7  ;;  %1057 = vmatprep.subr.bf16.mxu0 %v2828_v8  ;;  %v2836_v13 = vld [vmem:[#allocation2 + $0x284] ss:$16 sps:$4 sm:$0xff]   ;;  %v2839_v15 = vld [vmem:[#allocation2 + $0x280] ss:$16 sps:$4 sm:$0xff]   ;;  %v2921_v7 = vld [vmem:[#allocation2 + $0xe8] ss:$16 sps:$4 sm:$0xff]  }
  0x23   :  { %1100 = vmatprep.subr.bf16.mxu1 %v2830_v9  ;;  %v2840_v16 = vld [vmem:[#allocation2 + $0x64] ss:$16 sps:$4 sm:$0xff]   ;;  %v2844_v18 = vld [vmem:[#allocation2 + $0x60] ss:$16 sps:$4 sm:$0xff]   ;;  %v2929_v9 = vld [vmem:[#allocation2 + $0xcc] ss:$16 sps:$4 sm:$0xff]  }
  0x24   :  { %v2842_v17 = vld [vmem:[#allocation2 + $0x264] ss:$16 sps:$4 sm:$0xff]   ;;  %v2845_v19 = vld [vmem:[#allocation2 + $0x260] ss:$16 sps:$4 sm:$0xff]  }
  0x25   :  { %1058 = vmatpush1.bf16.msra.mxu0 %v2832_v10  ;;  %v2846_v20 = vld [vmem:[#allocation2 + $0x44] ss:$16 sps:$4 sm:$0xff]   ;;  %v2850_v22 = vld [vmem:[#allocation2 + $0x40] ss:$16 sps:$4 sm:$0xff]  }
  0x26   :  { %1101 = vmatpush1.bf16.msra.mxu1 %v2833_v11  ;;  %1059 = vmatprep.subr.bf16.mxu0 %v2834_v12  ;;  %v2848_v21 = vld [vmem:[#allocation2 + $0x244] ss:$16 sps:$4 sm:$0xff]   ;;  %v2851_v23 = vld [vmem:[#allocation2 + $0x240] ss:$16 sps:$4 sm:$0xff]   ;;  %v2927_v11 = vld [vmem:[#allocation2 + $0xc8] ss:$16 sps:$4 sm:$0xff]  }
  0x27   :  { %1102 = vmatprep.subr.bf16.mxu1 %v2836_v13  ;;  %v2852_v24 = vld [vmem:[#allocation2 + $0x24] ss:$16 sps:$4 sm:$0xff]   ;;  %v2856_v26 = vld [vmem:[#allocation2 + $0x20] ss:$16 sps:$4 sm:$0xff]   ;;  %v2935_v13 = vld [vmem:[#allocation2 + $0xac] ss:$16 sps:$4 sm:$0xff]  }
  0x28   :  { %v2854_v25 = vld [vmem:[#allocation2 + $0x224] ss:$16 sps:$4 sm:$0xff]   ;;  %v2857_v27 = vld [vmem:[#allocation2 + $0x220] ss:$16 sps:$4 sm:$0xff]  }
  0x29   :  { %1060 = vmatpush1.bf16.msra.mxu0 %v2838_v14  ;;  %v2858_v28 = vld [vmem:[#allocation2 + $0x4] ss:$16 sps:$4 sm:$0xff]   ;;  %v2862_v30 = vld [vmem:[#allocation2] ss:$16 sps:$4 sm:$0xff]   ;;  %v3275_v14 = vmov 0  }
  0x2a   :  { %1103 = vmatpush1.bf16.msra.mxu1 %v2839_v15  ;;  %1061 = vmatprep.subr.bf16.mxu0 %v2840_v16  ;;  %v2860_v29 = vld [vmem:[#allocation2 + $0x204] ss:$16 sps:$4 sm:$0xff]   ;;  %v2863_v31 = vld [vmem:[#allocation2 + $0x200] ss:$16 sps:$4 sm:$0xff]   ;;  %v2933_v16 = vld [vmem:[#allocation2 + $0xa8] ss:$16 sps:$4 sm:$0xff]  }
  0x2b   :  { %1104 = vmatprep.subr.bf16.mxu1 %v2842_v17  ;;  %v2864_v32 = vld [vmem:[#allocation2 + $0x1e4] ss:$16 sps:$4 sm:$0xff]   ;;  %v2868_v34 = vld [vmem:[#allocation2 + $0x1e0] ss:$16 sps:$4 sm:$0xff]  }
  0x2c   :  { %v2866_v33 = vld [vmem:[#allocation2 + $0x3e4] ss:$16 sps:$4 sm:$0xff]   ;;  %v2869_v35 = vld [vmem:[#allocation2 + $0x3e0] ss:$16 sps:$4 sm:$0xff]  }
  0x2d   :  { %1062 = vmatpush1.bf16.msra.mxu0 %v2844_v18  ;;  %v2870_v36 = vld [vmem:[#allocation2 + $0x1c4] ss:$16 sps:$4 sm:$0xff]   ;;  %v2874_v38 = vld [vmem:[#allocation2 + $0x1c0] ss:$16 sps:$4 sm:$0xff]   ;;  %v2941_v18 = vld [vmem:[#allocation2 + $0x8c] ss:$16 sps:$4 sm:$0xff]  }
  0x2e   :  { %1105 = vmatpush1.bf16.msra.mxu1 %v2845_v19  ;;  %1063 = vmatprep.subr.bf16.mxu0 %v2846_v20  ;;  %v2872_v37 = vld [vmem:[#allocation2 + $0x3c4] ss:$16 sps:$4 sm:$0xff]   ;;  %v2875_v39 = vld [vmem:[#allocation2 + $0x3c0] ss:$16 sps:$4 sm:$0xff]   ;;  %v2939_v20 = vld [vmem:[#allocation2 + $0x88] ss:$16 sps:$4 sm:$0xff]  }
  0x2f   :  { %1106 = vmatprep.subr.bf16.mxu1 %v2848_v21  ;;  %v2876_v40 = vld [vmem:[#allocation2 + $0x1a4] ss:$16 sps:$4 sm:$0xff]   ;;  %v2880_v42 = vld [vmem:[#allocation2 + $0x1a0] ss:$16 sps:$4 sm:$0xff]  }
  0x30   :  { %v2878_v41 = vld [vmem:[#allocation2 + $0x3a4] ss:$16 sps:$4 sm:$0xff]   ;;  %v2881_v43 = vld [vmem:[#allocation2 + $0x3a0] ss:$16 sps:$4 sm:$0xff]  }
  0x31   :  { %1064 = vmatpush1.bf16.msra.mxu0 %v2850_v22  ;;  %v2882_v44 = vld [vmem:[#allocation2 + $0x184] ss:$16 sps:$4 sm:$0xff]   ;;  %v2886_v46 = vld [vmem:[#allocation2 + $0x180] ss:$16 sps:$4 sm:$0xff]   ;;  %v2947_v22 = vld [vmem:[#allocation2 + $0x6c] ss:$16 sps:$4 sm:$0xff]  }
  0x32   :  { %1107 = vmatpush1.bf16.msra.mxu1 %v2851_v23  ;;  %1065 = vmatprep.subr.bf16.mxu0 %v2852_v24  ;;  %v2884_v45 = vld [vmem:[#allocation2 + $0x384] ss:$16 sps:$4 sm:$0xff]   ;;  %v2887_v47 = vld [vmem:[#allocation2 + $0x380] ss:$16 sps:$4 sm:$0xff]   ;;  %v2945_v24 = vld [vmem:[#allocation2 + $0x68] ss:$16 sps:$4 sm:$0xff]  }
  0x33   :  { %1108 = vmatprep.subr.bf16.mxu1 %v2854_v25  ;;  %v2888_v48 = vld [vmem:[#allocation2 + $0x164] ss:$16 sps:$4 sm:$0xff]   ;;  %v3310_v51 = vld [vmem:[%s3413_s0 + $0xc] ss:$20 sps:$4 sm:$0xff]  }
  0x34   :  { %v2914_v49 = vld [vmem:[%s3413_s0 + $0x4] ss:$20 sps:$4 sm:$0xff]   ;;  %v2892_v52 = vld [vmem:[#allocation2 + $0x160] ss:$16 sps:$4 sm:$0xff]   ;;  %1128 = vmatprep.mubr.bf16.mxu1 %v3310_v51 }
  0x35   :  { %1066 = vmatpush1.bf16.msra.mxu0 %v2856_v26  ;;  %v2890_v50 = vld [vmem:[#allocation2 + $0x364] ss:$16 sps:$4 sm:$0xff]   ;;  %1085 = vmatprep.mubr.bf16.mxu0 %v2914_v49  ;;  %v2893_v53 = vld [vmem:[#allocation2 + $0x360] ss:$16 sps:$4 sm:$0xff]   ;;  %v2953_v26 = vld [vmem:[#allocation2 + $0x4c] ss:$16 sps:$4 sm:$0xff]  }
  0x36   :  { %1109 = vmatpush1.bf16.msra.mxu1 %v2857_v27  ;;  %1067 = vmatprep.subr.bf16.mxu0 %v2858_v28  ;;  %v2894_v54 = vld [vmem:[#allocation2 + $0x144] ss:$16 sps:$4 sm:$0xff]   ;;  %v2898_v56 = vld [vmem:[#allocation2 + $0x140] ss:$16 sps:$4 sm:$0xff]   ;;  %v2951_v28 = vld [vmem:[#allocation2 + $0x48] ss:$16 sps:$4 sm:$0xff]  }
  0x37   :  { %1110 = vmatprep.subr.bf16.mxu1 %v2860_v29  ;;  %v2896_v55 = vld [vmem:[#allocation2 + $0x344] ss:$16 sps:$4 sm:$0xff]   ;;  %v2899_v57 = vld [vmem:[#allocation2 + $0x340] ss:$16 sps:$4 sm:$0xff]  }
  0x38   :  { %v2900_v58 = vld [vmem:[#allocation2 + $0x124] ss:$16 sps:$4 sm:$0xff]   ;;  %v2904_v60 = vld [vmem:[#allocation2 + $0x120] ss:$16 sps:$4 sm:$0xff]  }
  0x39   :  { %1068 = vmatpush1.bf16.msra.mxu0 %v2862_v30  ;;  %v2902_v59 = vld [vmem:[#allocation2 + $0x324] ss:$16 sps:$4 sm:$0xff]   ;;  %v2905_v61 = vld [vmem:[#allocation2 + $0x320] ss:$16 sps:$4 sm:$0xff]   ;;  %v2959_v30 = vld [vmem:[#allocation2 + $0x2c] ss:$16 sps:$4 sm:$0xff]  }
  0x3a   :  { %1111 = vmatpush1.bf16.msra.mxu1 %v2863_v31  ;;  %1069 = vmatprep.subr.bf16.mxu0 %v2864_v32  ;;  %v2906_v62 = vld [vmem:[#allocation2 + $0x104] ss:$16 sps:$4 sm:$0xff]   ;;  %v2910_v0 = vld [vmem:[#allocation2 + $0x100] ss:$16 sps:$4 sm:$0xff]   ;;  %v2957_v32 = vld [vmem:[#allocation2 + $0x28] ss:$16 sps:$4 sm:$0xff]  }
  0x3b   :  { %1112 = vmatprep.subr.bf16.mxu1 %v2866_v33  ;;  %v2908_v63 = vld [vmem:[#allocation2 + $0x304] ss:$16 sps:$4 sm:$0xff]   ;;  %v2911_v1 = vld [vmem:[#allocation2 + $0x300] ss:$16 sps:$4 sm:$0xff]  }
  0x3c   :  { %v2920_v2 = vld [vmem:[#allocation2 + $0x4e4] ss:$16 sps:$4 sm:$0xff]   ;;  %v2918_v6 = vld [vmem:[#allocation2 + $0x4e0] ss:$16 sps:$4 sm:$0xff]  }
  0x3d   :  { %1070 = vmatpush2.bf16.msra.mxu0 %v2868_v34  ;;  %v3316_v4 = vld [vmem:[%s3413_s0] ss:$20 sps:$4 sm:$0xff]   ;;  %v2965_v34 = vld [vmem:[#allocation2 + $0xc] ss:$16 sps:$4 sm:$0xff]  }
  0x3e   :  { %1113 = vmatpush2.bf16.msra.mxu1 %v2869_v35  ;;  %1071 = vmatprep.subr.bf16.mxu0 %v2870_v36  ;;  %v2926_v8 = vld [vmem:[#allocation2 + $0x4c4] ss:$16 sps:$4 sm:$0xff]   ;;  %v2924_v10 = vld [vmem:[#allocation2 + $0x4c0] ss:$16 sps:$4 sm:$0xff]   ;;  %v2963_v36 = vld [vmem:[#allocation2 + $0x8] ss:$16 sps:$4 sm:$0xff]  }
  0x3f   :  { %1114 = vmatprep.subr.bf16.mxu1 %v2872_v37  ;;  %v2932_v12 = vld [vmem:[#allocation2 + $0x4a4] ss:$16 sps:$4 sm:$0xff]   ;;  %v2930_v15 = vld [vmem:[#allocation2 + $0x4a0] ss:$16 sps:$4 sm:$0xff]   ;;  %v2969_v37 = vld [vmem:[#allocation2 + $0x1ec] ss:$16 sps:$4 sm:$0xff]  }
  0x40   :  { %v2938_v17 = vld [vmem:[#allocation2 + $0x484] ss:$16 sps:$4 sm:$0xff]   ;;  %v2936_v19 = vld [vmem:[#allocation2 + $0x480] ss:$16 sps:$4 sm:$0xff]  }
  0x41   :  { %1072 = vmatpush2.bf16.msra.mxu0 %v2874_v38  ;;  %v2944_v21 = vld [vmem:[#allocation2 + $0x464] ss:$16 sps:$4 sm:$0xff]   ;;  %v2942_v23 = vld [vmem:[#allocation2 + $0x460] ss:$16 sps:$4 sm:$0xff]   ;;  %v2972_v38 = vld [vmem:[#allocation2 + $0x2ec] ss:$16 sps:$4 sm:$0xff]  }
  0x42   :  { %1115 = vmatpush2.bf16.msra.mxu1 %v2875_v39  ;;  %1073 = vmatprep.subr.bf16.mxu0 %v2876_v40  ;;  %v2950_v25 = vld [vmem:[#allocation2 + $0x444] ss:$16 sps:$4 sm:$0xff]   ;;  %v2948_v27 = vld [vmem:[#allocation2 + $0x440] ss:$16 sps:$4 sm:$0xff]   ;;  %v2967_v40 = vld [vmem:[#allocation2 + $0x1e8] ss:$16 sps:$4 sm:$0xff]  }
  0x43   :  { %1116 = vmatprep.subr.bf16.mxu1 %v2878_v41  ;;  %v2956_v29 = vld [vmem:[#allocation2 + $0x424] ss:$16 sps:$4 sm:$0xff]   ;;  %v2954_v31 = vld [vmem:[#allocation2 + $0x420] ss:$16 sps:$4 sm:$0xff]   ;;  %v2970_v41 = vld [vmem:[#allocation2 + $0x2e8] ss:$16 sps:$4 sm:$0xff]  }
  0x44   :  { %v2962_v33 = vld [vmem:[#allocation2 + $0x404] ss:$16 sps:$4 sm:$0xff]   ;;  %v2960_v35 = vld [vmem:[#allocation2 + $0x400] ss:$16 sps:$4 sm:$0xff]  }
  0x45   :  { %1074 = vmatpush2.bf16.msra.mxu0 %v2880_v42  ;;  %v3329_v39 = vld [vmem:[%s3413_s0 + $0x10] ss:$20 sps:$4 sm:$0xff]   ;;  %v2975_v42 = vld [vmem:[#allocation2 + $0x1cc] ss:$16 sps:$4 sm:$0xff]  }
  0x46   :  { %1117 = vmatpush2.bf16.msra.mxu1 %v2881_v43  ;;  %1075 = vmatprep.subr.bf16.mxu0 %v2882_v44  ;;  %v2978_v43 = vld [vmem:[#allocation2 + $0x2cc] ss:$16 sps:$4 sm:$0xff]   ;;  %v2973_v44 = vld [vmem:[#allocation2 + $0x1c8] ss:$16 sps:$4 sm:$0xff]  }
  0x47   :  { %1118 = vmatprep.subr.bf16.mxu1 %v2884_v45  ;;  %v2976_v45 = vld [vmem:[#allocation2 + $0x2c8] ss:$16 sps:$4 sm:$0xff]  }
  0x49   :  { %1076 = vmatpush2.bf16.msra.mxu0 %v2886_v46  ;;  %v2981_v46 = vld [vmem:[#allocation2 + $0x1ac] ss:$16 sps:$4 sm:$0xff]  }
  0x4a   :  { %1119 = vmatpush2.bf16.msra.mxu1 %v2887_v47  ;;  %1077 = vmatprep.subr.bf16.mxu0 %v2888_v48  ;;  %v2984_v47 = vld [vmem:[#allocation2 + $0x2ac] ss:$16 sps:$4 sm:$0xff]   ;;  %v2979_v48 = vld [vmem:[#allocation2 + $0x1a8] ss:$16 sps:$4 sm:$0xff]  }
  0x4b   :  { %1120 = vmatprep.subr.bf16.mxu1 %v2890_v50  ;;  %v2987_v50 = vld [vmem:[#allocation2 + $0x18c] ss:$16 sps:$4 sm:$0xff]  }
  0x4d   :  { %1078 = vmatpush2.bf16.msra.mxu0 %v2892_v52  ;;  %v2990_v52 = vld [vmem:[#allocation2 + $0x28c] ss:$16 sps:$4 sm:$0xff]  }
  0x4e   :  { %1121 = vmatpush2.bf16.msra.mxu1 %v2893_v53  ;;  %1079 = vmatprep.subr.bf16.mxu0 %v2894_v54  ;;  %v2985_v53 = vld [vmem:[#allocation2 + $0x188] ss:$16 sps:$4 sm:$0xff]  }
  0x4f   :  { %1122 = vmatprep.subr.bf16.mxu1 %v2896_v55  ;;  %v2988_v54 = vld [vmem:[#allocation2 + $0x288] ss:$16 sps:$4 sm:$0xff]   ;;  %v2993_v55 = vld [vmem:[#allocation2 + $0x16c] ss:$16 sps:$4 sm:$0xff]  }
  0x51   :  { %1080 = vmatpush2.bf16.msra.mxu0 %v2898_v56  ;;  %v2996_v56 = vld [vmem:[#allocation2 + $0x26c] ss:$16 sps:$4 sm:$0xff]  }
  0x52   :  { %1123 = vmatpush2.bf16.msra.mxu1 %v2899_v57  ;;  %1081 = vmatprep.subr.bf16.mxu0 %v2900_v58  ;;  %v2991_v57 = vld [vmem:[#allocation2 + $0x168] ss:$16 sps:$4 sm:$0xff]  }
  0x53   :  { %1124 = vmatprep.subr.bf16.mxu1 %v2902_v59  ;;  %v2994_v58 = vld [vmem:[#allocation2 + $0x268] ss:$16 sps:$4 sm:$0xff]   ;;  %v2999_v59 = vld [vmem:[#allocation2 + $0x14c] ss:$16 sps:$4 sm:$0xff]  }
  0x55   :  { %1082 = vmatpush2.bf16.msra.mxu0 %v2904_v60  ;;  %v2997_v60 = vld [vmem:[#allocation2 + $0x148] ss:$16 sps:$4 sm:$0xff]  }
  0x56   :  { %1125 = vmatpush2.bf16.msra.mxu1 %v2905_v61  ;;  %1083 = vmatprep.subr.bf16.mxu0 %v2906_v62  ;;  %v3000_v61 = vld [vmem:[#allocation2 + $0x248] ss:$16 sps:$4 sm:$0xff]   ;;  %v3005_v62 = vld [vmem:[#allocation2 + $0x12c] ss:$16 sps:$4 sm:$0xff]  }
  0x57   :  { %1126 = vmatprep.subr.bf16.mxu1 %v2908_v63  ;;  %v3008_v63 = vld [vmem:[#allocation2 + $0x22c] ss:$16 sps:$4 sm:$0xff]  }
  0x59   :  { %1084 = vmatpush2.bf16.msra.mxu0 %v2910_v0  ;;  %v3003_v0 = vld [vmem:[#allocation2 + $0x128] ss:$16 sps:$4 sm:$0xff]  }
  0x5a   :  { %1127 = vmatpush2.bf16.msra.mxu1 %v2911_v1  ;;  %1139 = vmatprep.subr.bf16.mxu0 %v2920_v2  ;;  %v3006_v1 = vld [vmem:[#allocation2 + $0x228] ss:$16 sps:$4 sm:$0xff]   ;;  %v3011_v2 = vld [vmem:[#allocation2 + $0x10c] ss:$16 sps:$4 sm:$0xff]  }
  0x5b   :  { %1182 = vmatprep.subr.bf16.mxu1 %v2923_v3  ;;  %v3014_v3 = vld [vmem:[#allocation2 + $0x20c] ss:$16 sps:$4 sm:$0xff]  }
  0x5c   :  { %1086 = vmatmul.mubr.bf16.vlgmr.msra.gmra.mxu0 %v3316_v4 }
  0x5d   :  { %1129 = vmatmul.mubr.bf16.vlgmr.msra.gmra.mxu1 %v3321_v5  ;;  %1140 = vmatpush1.bf16.msra.mxu0 %v2918_v6  ;;  %v3009_v6 = vld [vmem:[#allocation2 + $0x108] ss:$16 sps:$4 sm:$0xff]  }
  0x5e   :  { %1183 = vmatpush1.bf16.msra.mxu1 %v2921_v7  ;;  %1141 = vmatprep.subr.bf16.mxu0 %v2926_v8  ;;  %v3012_v7 = vld [vmem:[#allocation2 + $0x208] ss:$16 sps:$4 sm:$0xff]   ;;  %v3017_v8 = vld [vmem:[#allocation2 + $0x3ec] ss:$16 sps:$4 sm:$0xff]  }
  0x5f   :  { %1184 = vmatprep.subr.bf16.mxu1 %v2929_v9  ;;  %1171 = vmatprep.mubr.bf16.mxu0 %v3275_v14  ;;  %v3020_v9 = vld [vmem:[#allocation2 + $0x4ec] ss:$16 sps:$4 sm:$0xff]  }
  0x60   :  { %1214 = vmatprep.mubr.bf16.mxu1 %v2914_v49  ;;  %v2982_v49 = vld [vmem:[#allocation2 + $0x2a8] ss:$16 sps:$4 sm:$0xff]  }
  0x61   :  { %1142 = vmatpush1.bf16.msra.mxu0 %v2924_v10  ;;  %v3015_v10 = vld [vmem:[#allocation2 + $0x3e8] ss:$16 sps:$4 sm:$0xff]  }
  0x62   :  { %1185 = vmatpush1.bf16.msra.mxu1 %v2927_v11  ;;  %1143 = vmatprep.subr.bf16.mxu0 %v2932_v12  ;;  %v3018_v11 = vld [vmem:[#allocation2 + $0x4e8] ss:$16 sps:$4 sm:$0xff]   ;;  %v3023_v12 = vld [vmem:[#allocation2 + $0x3cc] ss:$16 sps:$4 sm:$0xff]  }
  0x63   :  { %1186 = vmatprep.subr.bf16.mxu1 %v2935_v13  ;;  %v3026_v13 = vld [vmem:[#allocation2 + $0x4cc] ss:$16 sps:$4 sm:$0xff]  }
  0x65   :  { %1144 = vmatpush1.bf16.msra.mxu0 %v2930_v15  ;;  %v3021_v15 = vld [vmem:[#allocation2 + $0x3c8] ss:$16 sps:$4 sm:$0xff]  }
  0x66   :  { %1187 = vmatpush1.bf16.msra.mxu1 %v2933_v16  ;;  %1145 = vmatprep.subr.bf16.mxu0 %v2938_v17  ;;  %v3024_v16 = vld [vmem:[#allocation2 + $0x4c8] ss:$16 sps:$4 sm:$0xff]   ;;  %v3029_v17 = vld [vmem:[#allocation2 + $0x3ac] ss:$16 sps:$4 sm:$0xff]  }
  0x67   :  { %1188 = vmatprep.subr.bf16.mxu1 %v2941_v18  ;;  %v3032_v18 = vld [vmem:[#allocation2 + $0x4ac] ss:$16 sps:$4 sm:$0xff]  }
  0x69   :  { %1146 = vmatpush1.bf16.msra.mxu0 %v2936_v19  ;;  %v3027_v19 = vld [vmem:[#allocation2 + $0x3a8] ss:$16 sps:$4 sm:$0xff]  }
  0x6a   :  { %1189 = vmatpush1.bf16.msra.mxu1 %v2939_v20  ;;  %1147 = vmatprep.subr.bf16.mxu0 %v2944_v21  ;;  %v3030_v20 = vld [vmem:[#allocation2 + $0x4a8] ss:$16 sps:$4 sm:$0xff]   ;;  %v3035_v21 = vld [vmem:[#allocation2 + $0x38c] ss:$16 sps:$4 sm:$0xff]  }
  0x6b   :  { %1190 = vmatprep.subr.bf16.mxu1 %v2947_v22  ;;  %v3038_v22 = vld [vmem:[#allocation2 + $0x48c] ss:$16 sps:$4 sm:$0xff]  }
  0x6d   :  { %1148 = vmatpush1.bf16.msra.mxu0 %v2942_v23  ;;  %v3033_v23 = vld [vmem:[#allocation2 + $0x388] ss:$16 sps:$4 sm:$0xff]  }
  0x6e   :  { %1191 = vmatpush1.bf16.msra.mxu1 %v2945_v24  ;;  %1149 = vmatprep.subr.bf16.mxu0 %v2950_v25  ;;  %v3041_v24 = vld [vmem:[#allocation2 + $0x36c] ss:$16 sps:$4 sm:$0xff]  }
  0x6f   :  { %1192 = vmatprep.subr.bf16.mxu1 %v2953_v26  ;;  %v3044_v25 = vld [vmem:[#allocation2 + $0x46c] ss:$16 sps:$4 sm:$0xff]   ;;  %v3039_v26 = vld [vmem:[#allocation2 + $0x368] ss:$16 sps:$4 sm:$0xff]  }
  0x71   :  { %1150 = vmatpush1.bf16.msra.mxu0 %v2948_v27  ;;  %v3042_v27 = vld [vmem:[#allocation2 + $0x468] ss:$16 sps:$4 sm:$0xff]  }
  0x72   :  { %1193 = vmatpush1.bf16.msra.mxu1 %v2951_v28  ;;  %1151 = vmatprep.subr.bf16.mxu0 %v2956_v29  ;;  %v3047_v28 = vld [vmem:[#allocation2 + $0x34c] ss:$16 sps:$4 sm:$0xff]  }
  0x73   :  { %1194 = vmatprep.subr.bf16.mxu1 %v2959_v30  ;;  %v3050_v29 = vld [vmem:[#allocation2 + $0x44c] ss:$16 sps:$4 sm:$0xff]   ;;  %v3048_v30 = vld [vmem:[#allocation2 + $0x448] ss:$16 sps:$4 sm:$0xff]  }
  0x75   :  { %1152 = vmatpush1.bf16.msra.mxu0 %v2954_v31  ;;  %v3053_v31 = vld [vmem:[#allocation2 + $0x32c] ss:$16 sps:$4 sm:$0xff]  }
  0x76   :  { %1195 = vmatpush1.bf16.msra.mxu1 %v2957_v32  ;;  %1153 = vmatprep.subr.bf16.mxu0 %v2962_v33  ;;  %v3056_v32 = vld [vmem:[#allocation2 + $0x42c] ss:$16 sps:$4 sm:$0xff]   ;;  %v3051_v33 = vld [vmem:[#allocation2 + $0x328] ss:$16 sps:$4 sm:$0xff]  }
  0x77   :  { %1196 = vmatprep.subr.bf16.mxu1 %v2965_v34  ;;  %v3054_v34 = vld [vmem:[#allocation2 + $0x428] ss:$16 sps:$4 sm:$0xff]  }
  0x79   :  { %1154 = vmatpush1.bf16.msra.mxu0 %v2960_v35  ;;  %v3059_v35 = vld [vmem:[#allocation2 + $0x30c] ss:$16 sps:$4 sm:$0xff]  }
  0x7a   :  { %1197 = vmatpush1.bf16.msra.mxu1 %v2963_v36  ;;  %1225 = vmatprep.subr.bf16.mxu0 %v2972_v38  ;;  %v3062_v36 = vld [vmem:[#allocation2 + $0x40c] ss:$16 sps:$4 sm:$0xff]   ;;  %v3060_v38 = vld [vmem:[#allocation2 + $0x408] ss:$16 sps:$4 sm:$0xff]  }
  0x7b   :  { %1198 = vmatprep.subr.bf16.mxu1 %v2969_v37  ;;  %v3057_v37 = vld [vmem:[#allocation2 + $0x308] ss:$16 sps:$4 sm:$0xff]  }
  0x7c   :  { %1172 = vmatmul.mubr.bf16.vlgmr.msra.gmra.mxu0 %v3329_v39 }
  0x7d   :  { %1226 = vmatpush1.bf16.msra.mxu0 %v2970_v41  ;;  %1257 = vmatprep.mubr.bf16.mxu0 %v3310_v51  ;;  %v3002_v51 = vld [vmem:[#allocation2 + $0x24c] ss:$16 sps:$4 sm:$0xff]   ;;  %v3064_v41 = vld [vmem:[#allocation2 + $0x5e0] ss:$16 sps:$4 sm:$0xff]  }
  0x7e   :  { %1199 = vmatpush2.bf16.msra.mxu1 %v2967_v40  ;;  %1227 = vmatprep.subr.bf16.mxu0 %v2978_v43  ;;  %v3063_v40 = vld [vmem:[#allocation2 + $0x6e0] ss:$16 sps:$4 sm:$0xff]  }
  0x7f   :  { %1200 = vmatprep.subr.bf16.mxu1 %v2975_v42  ;;  %v3065_v42 = vld [vmem:[#allocation2 + $0x6c0] ss:$16 sps:$4 sm:$0xff]  }
  0x80   :  { %v3066_v43 = vld [vmem:[#allocation2 + $0x5c0] ss:$16 sps:$4 sm:$0xff]  }
  0x81   :  { %1228 = vmatpush1.bf16.msra.mxu0 %v2976_v45  ;;  %v3068_v45 = vld [vmem:[#allocation2 + $0x5a0] ss:$16 sps:$4 sm:$0xff]  }
  0x82   :  { %1201 = vmatpush2.bf16.msra.mxu1 %v2973_v44  ;;  %1229 = vmatprep.subr.bf16.mxu0 %v2984_v47  ;;  %v3067_v44 = vld [vmem:[#allocation2 + $0x6a0] ss:$16 sps:$4 sm:$0xff]  }
  0x83   :  { %1202 = vmatprep.subr.bf16.mxu1 %v2981_v46  ;;  %v3069_v46 = vld [vmem:[#allocation2 + $0x680] ss:$16 sps:$4 sm:$0xff]  }
  0x84   :  { %v3070_v47 = vld [vmem:[#allocation2 + $0x580] ss:$16 sps:$4 sm:$0xff]  }
  0x85   :  { %1230 = vmatpush1.bf16.msra.mxu0 %v2982_v49  ;;  %v3072_v49 = vld [vmem:[#allocation2 + $0x560] ss:$16 sps:$4 sm:$0xff]  }
  0x86   :  { %1203 = vmatpush2.bf16.msra.mxu1 %v2979_v48  ;;  %1231 = vmatprep.subr.bf16.mxu0 %v2990_v52  ;;  %v3071_v48 = vld [vmem:[#allocation2 + $0x660] ss:$16 sps:$4 sm:$0xff]  }
  0x87   :  { %1204 = vmatprep.subr.bf16.mxu1 %v2987_v50  ;;  %v3073_v50 = vld [vmem:[#allocation2 + $0x640] ss:$16 sps:$4 sm:$0xff]  }
  0x88   :  { %v3076_v52 = vld [vmem:[#allocation2 + $0x520] ss:$16 sps:$4 sm:$0xff]  }
  0x89   :  { %1232 = vmatpush1.bf16.msra.mxu0 %v2988_v54  ;;  %v3078_v54 = vld [vmem:[#allocation2 + $0x500] ss:$16 sps:$4 sm:$0xff]  }
  0x8a   :  { %1205 = vmatpush2.bf16.msra.mxu1 %v2985_v53  ;;  %1233 = vmatprep.subr.bf16.mxu0 %v2996_v56  ;;  %v3077_v53 = vld [vmem:[#allocation2 + $0x600] ss:$16 sps:$4 sm:$0xff]  }
  0x8b   :  { %1206 = vmatprep.subr.bf16.mxu1 %v2993_v55  ;;  %v3081_v55 = vld [vmem:[#allocation2 + $0x9e4] ss:$16 sps:$4 sm:$0xff]   ;;  %v3106_v56 = vld [vmem:[#allocation2 + $0x8e0] ss:$16 sps:$4 sm:$0xff]  }
  0x8d   :  { %1234 = vmatpush1.bf16.msra.mxu0 %v2994_v58  ;;  %v3111_v58 = vld [vmem:[#allocation2 + $0x8c0] ss:$16 sps:$4 sm:$0xff]  }
  0x8e   :  { %1207 = vmatpush2.bf16.msra.mxu1 %v2991_v57  ;;  %1235 = vmatprep.subr.bf16.mxu0 %v3002_v51  ;;  %v3107_v57 = vld [vmem:[#allocation2 + $0x7e0] ss:$16 sps:$4 sm:$0xff]  }
  0x8f   :  { %1208 = vmatprep.subr.bf16.mxu1 %v2999_v59  ;;  %v3112_v59 = vld [vmem:[#allocation2 + $0x7c0] ss:$16 sps:$4 sm:$0xff]  }
  0x90   :  { %v3116_v51 = vld [vmem:[#allocation2 + $0x8a0] ss:$16 sps:$4 sm:$0xff]  }
  0x91   :  { %1236 = vmatpush1.bf16.msra.mxu0 %v3000_v61  ;;  %v3121_v61 = vld [vmem:[#allocation2 + $0x880] ss:$16 sps:$4 sm:$0xff]  }
  0x92   :  { %1209 = vmatpush2.bf16.msra.mxu1 %v2997_v60  ;;  %1237 = vmatprep.subr.bf16.mxu0 %v3008_v63  ;;  %v3117_v60 = vld [vmem:[#allocation2 + $0x7a0] ss:$16 sps:$4 sm:$0xff]  }
  0x93   :  { %1210 = vmatprep.subr.bf16.mxu1 %v3005_v62  ;;  %v3122_v62 = vld [vmem:[#allocation2 + $0x780] ss:$16 sps:$4 sm:$0xff]  }
  0x94   :  { %v3126_v63 = vld [vmem:[#allocation2 + $0x860] ss:$16 sps:$4 sm:$0xff]  }
  0x95   :  { %1238 = vmatpush1.bf16.msra.mxu0 %v3006_v1  ;;  %v3131_v1 = vld [vmem:[#allocation2 + $0x840] ss:$16 sps:$4 sm:$0xff]  }
  0x96   :  { %1211 = vmatpush2.bf16.msra.mxu1 %v3003_v0  ;;  %1239 = vmatprep.subr.bf16.mxu0 %v3014_v3  ;;  %v3127_v0 = vld [vmem:[#allocation2 + $0x760] ss:$16 sps:$4 sm:$0xff]  }
  0x97   :  { %1212 = vmatprep.subr.bf16.mxu1 %v3011_v2  ;;  %v3132_v2 = vld [vmem:[#allocation2 + $0x740] ss:$16 sps:$4 sm:$0xff]  }
  0x98   :  { %v3136_v3 = vld [vmem:[#allocation2 + $0x820] ss:$16 sps:$4 sm:$0xff]  }
  0x99   :  { %1240 = vmatpush1.bf16.msra.mxu0 %v3012_v7  ;;  %v3141_v7 = vld [vmem:[#allocation2 + $0x800] ss:$16 sps:$4 sm:$0xff]  }
  0x9a   :  { %1213 = vmatpush2.bf16.msra.mxu1 %v3009_v6  ;;  %1241 = vmatprep.subr.bf16.mxu0 %v3017_v8  ;;  %v3137_v6 = vld [vmem:[#allocation2 + $0x720] ss:$16 sps:$4 sm:$0xff]  }
  0x9b   :  { %1268 = vmatprep.subr.bf16.mxu1 %v3020_v9  ;;  %v3142_v8 = vld [vmem:[#allocation2 + $0x700] ss:$16 sps:$4 sm:$0xff]   ;;  %v3145_v9 = vld [vmem:[#allocation2 + $0xbe4] ss:$16 sps:$4 sm:$0xff]  }
  0x9d   :  { %1215 = vmatmul.mubr.bf16.vlgmr.msra.gmra.mxu1 %v3316_v4  ;;  %1242 = vmatpush2.bf16.msra.mxu0 %v3015_v10  ;;  %v3036_v4 = vld [vmem:[#allocation2 + $0x488] ss:$16 sps:$4 sm:$0xff]   ;;  %v211_v10 = vlaneseq }
  0x9e   :  { %1269 = vmatpush1.bf16.msra.mxu1 %v3018_v11  ;;  %1243 = vmatprep.subr.bf16.mxu0 %v3023_v12 }
  0x9f   :  { %1270 = vmatprep.subr.bf16.mxu1 %v3026_v13  ;;  %1300 = vmatprep.mubr.bf16.mxu1 %v3275_v14  ;;  %v3045_v14 = vld [vmem:[#allocation2 + $0x348] ss:$16 sps:$4 sm:$0xff]   ;;  %v3338_v12 = vshrl.u32 %v211_v10, 7 }
  0xa1   :  { %1244 = vmatpush2.bf16.msra.mxu0 %v3021_v15  ;;  %v3341_v15 = vsub.s32 0, %v3338_v12 }
  0xa2   :  { %1271 = vmatpush1.bf16.msra.mxu1 %v3024_v16  ;;  %1245 = vmatprep.subr.bf16.mxu0 %v3029_v17  ;;  %v3343_v17 = vld [vmem:[#allocation4 + $0x8] sm:$0xff] }
  0xa3   :  { %1272 = vmatprep.subr.bf16.mxu1 %v3032_v18 }
  0xa5   :  { %1246 = vmatpush2.bf16.msra.mxu0 %v3027_v19  ;;  %v3345_v19 = vld [vmem:[#allocation4] sm:$0xff] }
  0xa6   :  { %1273 = vmatpush1.bf16.msra.mxu1 %v3030_v20  ;;  %1247 = vmatprep.subr.bf16.mxu0 %v3035_v21  ;;  %v218_v20 = vrot.slane %v3343_v17, %v3341_v15 }
  0xa7   :  { %1274 = vmatprep.subr.bf16.mxu1 %v3038_v22  ;;  %v214_v22 = vrot.slane %v3345_v19, %v3341_v15 }
  0xa9   :  { %1248 = vmatpush2.bf16.msra.mxu0 %v3033_v23 }
  0xaa   :  { %1275 = vmatpush1.bf16.msra.mxu1 %v3036_v4  ;;  %1249 = vmatprep.subr.bf16.mxu0 %v3041_v24 }
  0xab   :  { %1276 = vmatprep.subr.bf16.mxu1 %v3044_v25 }
  0xad   :  { %1250 = vmatpush2.bf16.msra.mxu0 %v3039_v26 }
  0xae   :  { %1277 = vmatpush1.bf16.msra.mxu1 %v3042_v27  ;;  %1251 = vmatprep.subr.bf16.mxu0 %v3047_v28 }
  0xaf   :  { %1278 = vmatprep.subr.bf16.mxu1 %v3050_v29 }
  0xb1   :  { %1252 = vmatpush2.bf16.msra.mxu0 %v3045_v14 }
  0xb2   :  { %1279 = vmatpush1.bf16.msra.mxu1 %v3048_v30  ;;  %1253 = vmatprep.subr.bf16.mxu0 %v3053_v31 }
  0xb3   :  { %1280 = vmatprep.subr.bf16.mxu1 %v3056_v32 }
  0xb5   :  { %1254 = vmatpush2.bf16.msra.mxu0 %v3051_v33 }
  0xb6   :  { %1281 = vmatpush1.bf16.msra.mxu1 %v3054_v34  ;;  %1255 = vmatprep.subr.bf16.mxu0 %v3059_v35 }
  0xb7   :  { %1282 = vmatprep.subr.bf16.mxu1 %v3062_v36 }
  0xb9   :  { %1256 = vmatpush2.bf16.msra.mxu0 %v3057_v37 }
  0xba   :  { %1283 = vmatpush1.bf16.msra.mxu1 %v3060_v38  ;;  %2707 = vmatprep.subr.bf16.mxu0 %v3063_v40 }
  0xbb   :  { %2729 = vmatprep.subr.bf16.mxu1 %v3106_v56  ;;  %v3099_v56 = vld [vmem:[#allocation2 + $0x924] ss:$16 sps:$4 sm:$0xff]  }
  0xbc   :  { %1258 = vmatmul.mubr.bf16.vlgmr.msra.gmra.mxu0 %v3321_v5  ;;  %v3074_v5 = vld [vmem:[#allocation2 + $0x540] ss:$16 sps:$4 sm:$0xff]  }
  0xbd   :  { %1301 = vmatmul.mubr.bf16.vlgmr.msra.gmra.mxu1 %v3329_v39  ;;  %2708 = vmatpush3.bf16.msra.mxu0 %v3064_v41  ;;  %v3075_v39 = vld [vmem:[#allocation2 + $0x620] ss:$16 sps:$4 sm:$0xff]  }
  0xbe   :  { %2709 = vmatprep.subr.bf16.mxu0 %v3065_v42  ;;  %2730 = vmatpush3.bf16.msra.mxu1 %v3107_v57  ;;  %v3097_v57 = vld [vmem:[#allocation2 + $0x920] ss:$16 sps:$4 sm:$0xff]  }
  0xbf   :  { %2731 = vmatprep.subr.bf16.mxu1 %v3111_v58  ;;  %v3102_v58 = vld [vmem:[#allocation2 + $0x904] ss:$16 sps:$4 sm:$0xff]  }
  0xc1   :  { %2710 = vmatpush3.bf16.msra.mxu0 %v3066_v43 }
  0xc2   :  { %2711 = vmatprep.subr.bf16.mxu0 %v3067_v44  ;;  %2732 = vmatpush3.bf16.msra.mxu1 %v3112_v59  ;;  %v3079_v44 = vld [vmem:[#allocation2 + $0x9e0] ss:$16 sps:$4 sm:$0xff]  }
  0xc3   :  { %2733 = vmatprep.subr.bf16.mxu1 %v3116_v51  ;;  %v3100_v59 = vld [vmem:[#allocation2 + $0x900] ss:$16 sps:$4 sm:$0xff]   ;;  %v3105_v51 = vld [vmem:[#allocation2 + $0xae4] ss:$16 sps:$4 sm:$0xff]  }
  0xc5   :  { %2712 = vmatpush3.bf16.msra.mxu0 %v3068_v45 }
  0xc6   :  { %2713 = vmatprep.subr.bf16.mxu0 %v3069_v46  ;;  %2734 = vmatpush3.bf16.msra.mxu1 %v3117_v60  ;;  %v3084_v46 = vld [vmem:[#allocation2 + $0x9c4] ss:$16 sps:$4 sm:$0xff]   ;;  %v3103_v60 = vld [vmem:[#allocation2 + $0xae0] ss:$16 sps:$4 sm:$0xff]  }
  0xc7   :  { %2735 = vmatprep.subr.bf16.mxu1 %v3121_v61  ;;  %v3110_v61 = vld [vmem:[#allocation2 + $0xac4] ss:$16 sps:$4 sm:$0xff]  }
  0xc9   :  { %2714 = vmatpush3.bf16.msra.mxu0 %v3070_v47 }
  0xca   :  { %2715 = vmatprep.subr.bf16.mxu0 %v3071_v48  ;;  %2736 = vmatpush3.bf16.msra.mxu1 %v3122_v62  ;;  %v3082_v48 = vld [vmem:[#allocation2 + $0x9c0] ss:$16 sps:$4 sm:$0xff]  }
  0xcb   :  { %2737 = vmatprep.subr.bf16.mxu1 %v3126_v63  ;;  %v3108_v62 = vld [vmem:[#allocation2 + $0xac0] ss:$16 sps:$4 sm:$0xff]   ;;  %v3115_v63 = vld [vmem:[#allocation2 + $0xaa4] ss:$16 sps:$4 sm:$0xff]  }
  0xcd   :  { %2716 = vmatpush3.bf16.msra.mxu0 %v3072_v49  ;;  %v3087_v49 = vld [vmem:[#allocation2 + $0x9a4] ss:$16 sps:$4 sm:$0xff]  }
  0xce   :  { %2717 = vmatprep.subr.bf16.mxu0 %v3073_v50  ;;  %2738 = vmatpush3.bf16.msra.mxu1 %v3127_v0  ;;  %v3085_v50 = vld [vmem:[#allocation2 + $0x9a0] ss:$16 sps:$4 sm:$0xff]  }
  0xcf   :  { %2739 = vmatprep.subr.bf16.mxu1 %v3131_v1  ;;  %v3113_v0 = vld [vmem:[#allocation2 + $0xaa0] ss:$16 sps:$4 sm:$0xff]  }
  0xd1   :  { %2718 = vmatpush3.bf16.msra.mxu0 %v3074_v5  ;;  %v3090_v5 = vld [vmem:[#allocation2 + $0x984] ss:$16 sps:$4 sm:$0xff]  }
  0xd2   :  { %2719 = vmatprep.subr.bf16.mxu0 %v3075_v39  ;;  %2740 = vmatpush3.bf16.msra.mxu1 %v3132_v2  ;;  %v3088_v39 = vld [vmem:[#allocation2 + $0x980] ss:$16 sps:$4 sm:$0xff]   ;;  %v3120_v2 = vld [vmem:[#allocation2 + $0xa84] ss:$16 sps:$4 sm:$0xff]  }
  0xd3   :  { %2741 = vmatprep.subr.bf16.mxu1 %v3136_v3  ;;  %v3118_v3 = vld [vmem:[#allocation2 + $0xa80] ss:$16 sps:$4 sm:$0xff]  }
  0xd5   :  { %2720 = vmatpush3.bf16.msra.mxu0 %v3076_v52  ;;  %v3093_v52 = vld [vmem:[#allocation2 + $0x964] ss:$16 sps:$4 sm:$0xff]  }
  0xd6   :  { %2721 = vmatprep.subr.bf16.mxu0 %v3077_v53  ;;  %2742 = vmatpush3.bf16.msra.mxu1 %v3137_v6  ;;  %v3091_v53 = vld [vmem:[#allocation2 + $0x960] ss:$16 sps:$4 sm:$0xff]  }
  0xd7   :  { %2743 = vmatprep.subr.bf16.mxu1 %v3141_v7  ;;  %v3125_v7 = vld [vmem:[#allocation2 + $0xa64] ss:$16 sps:$4 sm:$0xff]  }
  0xd9   :  { %2722 = vmatpush3.bf16.msra.mxu0 %v3078_v54  ;;  %v3096_v54 = vld [vmem:[#allocation2 + $0x944] ss:$16 sps:$4 sm:$0xff]  }
  0xda   :  { %2061 = vmatprep.subr.bf16.mxu0 %v3081_v55  ;;  %2744 = vmatpush3.bf16.msra.mxu1 %v3142_v8  ;;  %v3094_v55 = vld [vmem:[#allocation2 + $0x940] ss:$16 sps:$4 sm:$0xff]  }
  0xdb   :  { %2104 = vmatprep.subr.bf16.mxu1 %v3145_v9  ;;  %v3123_v8 = vld [vmem:[#allocation2 + $0xa60] ss:$16 sps:$4 sm:$0xff]   ;;  %v50_v9 = vld [vmem:[#allocation4 + $0x18] sm:$0xff] }
 0x11c   :  { %v1087_v11 = vpop.f32.mrf.mxu0 }
 0x11d   :  { %v1130_v16 = vpop.f32.mrf.mxu1  ;;  %v1088_v28 = vadd.f32 %v1087_v11, %v214_v22 }
 0x11e   :  { %v1089_v13 = vpop.f32.mrf.mxu0 }
 0x11f   :  { %v1132_v21 = vpop.f32.mrf.mxu1  ;;  %v1090_v4 = vadd.f32 %v1089_v13, %v218_v20  ;;  %v1131_v35 = vadd.f32 %v1130_v16, %v1088_v28  ;;  %v3130_v13 = vld [vmem:[#allocation2 + $0xa44] ss:$16 sps:$4 sm:$0xff]  }
 0x120   :  { %v1091_v18 = vpop.f32.mrf.mxu0  ;;  %v49_v16 = vld [vmem:[#allocation4 + $0x10] sm:$0xff] }
 0x121   :  { %v1092_v24 = vadd.f32 %v1091_v18, %v214_v22  ;;  %v1134_v25 = vpop.f32.mrf.mxu1  ;;  %v1133_v14 = vadd.f32 %v1132_v21, %v1090_v4  ;;  %v226_v18 = vrot.slane %v50_v9, %v3341_v15  ;;  %v3135_v22 = vld [vmem:[#allocation2 + $0xa24] ss:$16 sps:$4 sm:$0xff]   ;;  %v3173_v9 = vld [vmem:[#allocation2 + $0xca0] ss:$16 sps:$4 sm:$0xff]  }
 0x122   :  { %v1093_v23 = vpop.f32.mrf.mxu0 }
 0x123   :  { %v1094_v27 = vadd.f32 %v1093_v23, %v218_v20  ;;  %v1135_v30 = vadd.f32 %v1134_v25, %v1092_v24  ;;  %v1136_v31 = vpop.f32.mrf.mxu1  ;;  %v3128_v20 = vld [vmem:[#allocation2 + $0xa40] ss:$16 sps:$4 sm:$0xff]   ;;  %v222_v23 = vrot.slane %v49_v16, %v3341_v15  ;;  %v3181_v16 = vld [vmem:[#allocation2 + $0xc64] ss:$16 sps:$4 sm:$0xff]  }
 0x125   :  { %v1137_v33 = vadd.f32 %v1136_v31, %v1094_v27 }
 0x13c   :  { %v1173_v26 = vpop.f32.mrf.mxu0 }
 0x13d   :  { %v3353_v40 = vadd.f32 %v1173_v26, %v1131_v35  ;;  %v3133_v26 = vld [vmem:[#allocation2 + $0xa20] ss:$16 sps:$4 sm:$0xff]  }
 0x13e   :  { %v1175_v29 = vpop.f32.mrf.mxu0 }
 0x13f   :  { %v1176_v34 = vadd.f32 %v1175_v29, %v1133_v14  ;;  %v3140_v29 = vld [vmem:[#allocation2 + $0xa04] ss:$16 sps:$4 sm:$0xff]  }
 0x140   :  { %v1177_v32 = vpop.f32.mrf.mxu0 }
 0x141   :  { %v3351_v36 = vadd.f32 %v1177_v32, %v1135_v30  ;;  %v1658_v41 = vmax.f32 %v1176_v34, 0.0 }
 0x142   :  { %v1179_v37 = vpop.f32.mrf.mxu0 }
 0x143   :  { %v1180_v38 = vadd.f32 %v1179_v37, %v1137_v33  ;;  %v1311_v45 = vpack.c.bf16 %v3351_v36, %v3353_v40  ;;  %v3138_v37 = vld [vmem:[#allocation2 + $0xa00] ss:$16 sps:$4 sm:$0xff]   ;;  %v1661_v15 = vmax.f32 %v3351_v36, 0.0 }
 0x145   :  { %v1312_v42 = vpack.c.bf16 %v1180_v38, %v1176_v34  ;;  %v1662_v43 = vmax.f32 %v1180_v38, 0.0 }
 0x147   :  { %1607 = vmatprep.mubr.bf16.mxu0 %v1312_v42  ;;  %v1666_v47 = vpack.c.bf16 %v1662_v43, %v1658_v41 }
 0x148   :  { %1608 = vmatmul.mubr.bf16.vlgmr.msra.gmra.mxu0 %v1311_v45 }
 0x149   :  { %2062 = vmatpush1.bf16.msra.mxu0 %v3079_v44  ;;  %2093 = vmatprep.mubr.bf16.mxu0 %v1666_v47  ;;  %v1657_v44 = vmax.f32 %v3353_v40, 0.0  ;;  %v3146_v40 = vld [vmem:[#allocation2 + $0xbc0] ss:$16 sps:$4 sm:$0xff]  }
 0x14a   :  { %2063 = vmatprep.subr.bf16.mxu0 %v3084_v46 }
 0x14d   :  { %2064 = vmatpush1.bf16.msra.mxu0 %v3082_v48  ;;  %v1665_v48 = vpack.c.bf16 %v1661_v15, %v1657_v44  ;;  %v3199_v44 = vld [vmem:[#allocation2 + $0xee0] ss:$16 sps:$4 sm:$0xff]  }
 0x14e   :  { %2065 = vmatprep.subr.bf16.mxu0 %v3087_v49 }
 0x151   :  { %2066 = vmatpush1.bf16.msra.mxu0 %v3085_v50 }
 0x152   :  { %2067 = vmatprep.subr.bf16.mxu0 %v3090_v5 }
 0x155   :  { %2068 = vmatpush1.bf16.msra.mxu0 %v3088_v39 }
 0x156   :  { %2069 = vmatprep.subr.bf16.mxu0 %v3093_v52  ;;  %v3143_v52 = vld [vmem:[#allocation2 + $0xbe0] ss:$16 sps:$4 sm:$0xff]  }
 0x159   :  { %2070 = vmatpush1.bf16.msra.mxu0 %v3091_v53  ;;  %v3148_v53 = vld [vmem:[#allocation2 + $0xbc4] ss:$16 sps:$4 sm:$0xff]  }
 0x15a   :  { %2071 = vmatprep.subr.bf16.mxu0 %v3096_v54 }
 0x15d   :  { %2072 = vmatpush1.bf16.msra.mxu0 %v3094_v55  ;;  %v1216_v1 = vpop.f32.mrf.mxu1  ;;  %v3151_v55 = vld [vmem:[#allocation2 + $0xba4] ss:$16 sps:$4 sm:$0xff]  }
 0x15e   :  { %2073 = vmatprep.subr.bf16.mxu0 %v3099_v56  ;;  %v1217_v31 = vadd.f32 %v1216_v1, %v222_v23  ;;  %v3149_v56 = vld [vmem:[#allocation2 + $0xba0] ss:$16 sps:$4 sm:$0xff]  }
 0x15f   :  { %v1218_v6 = vpop.f32.mrf.mxu1  ;;  %v3164_v1 = vld [vmem:[#allocation2 + $0xb00] ss:$16 sps:$4 sm:$0xff]  }
 0x160   :  { %v1219_v25 = vadd.f32 %v1218_v6, %v226_v18  ;;  %v3172_v6 = vld [vmem:[#allocation2 + $0xcc4] ss:$16 sps:$4 sm:$0xff]  }
 0x161   :  { %2074 = vmatpush1.bf16.msra.mxu0 %v3097_v57  ;;  %v1220_v11 = vpop.f32.mrf.mxu1  ;;  %v3154_v57 = vld [vmem:[#allocation2 + $0xb84] ss:$16 sps:$4 sm:$0xff]  }
 0x162   :  { %2075 = vmatprep.subr.bf16.mxu0 %v3102_v58  ;;  %v1221_v14 = vadd.f32 %v1220_v11, %v222_v23  ;;  %v3152_v58 = vld [vmem:[#allocation2 + $0xb80] ss:$16 sps:$4 sm:$0xff]   ;;  %v3178_v11 = vld [vmem:[#allocation2 + $0xc84] ss:$16 sps:$4 sm:$0xff]  }
 0x163   :  { %v1222_v21 = vpop.f32.mrf.mxu1  ;;  %v3185_v23 = vld [vmem:[#allocation2 + $0xc20] ss:$16 sps:$4 sm:$0xff]  }
 0x164   :  { %v1223_v34 = vadd.f32 %v1222_v21, %v226_v18  ;;  %v3179_v18 = vld [vmem:[#allocation2 + $0xc60] ss:$16 sps:$4 sm:$0xff]  }
 0x165   :  { %2076 = vmatpush1.bf16.msra.mxu0 %v3100_v59  ;;  %v3157_v59 = vld [vmem:[#allocation2 + $0xb64] ss:$16 sps:$4 sm:$0xff]   ;;  %v3182_v21 = vld [vmem:[#allocation2 + $0xc40] ss:$16 sps:$4 sm:$0xff]  }
 0x166   :  { %2077 = vmatprep.subr.bf16.mxu0 %v3105_v51  ;;  %v3155_v51 = vld [vmem:[#allocation2 + $0xb60] ss:$16 sps:$4 sm:$0xff]  }
 0x169   :  { %2078 = vmatpush2.bf16.msra.mxu0 %v3103_v60  ;;  %v3160_v60 = vld [vmem:[#allocation2 + $0xb44] ss:$16 sps:$4 sm:$0xff]  }
 0x16a   :  { %2079 = vmatprep.subr.bf16.mxu0 %v3110_v61  ;;  %v3158_v61 = vld [vmem:[#allocation2 + $0xb40] ss:$16 sps:$4 sm:$0xff]  }
 0x16d   :  { %2080 = vmatpush2.bf16.msra.mxu0 %v3108_v62  ;;  %v3163_v62 = vld [vmem:[#allocation2 + $0xb24] ss:$16 sps:$4 sm:$0xff]  }
 0x16e   :  { %2081 = vmatprep.subr.bf16.mxu0 %v3115_v63  ;;  %v3161_v63 = vld [vmem:[#allocation2 + $0xb20] ss:$16 sps:$4 sm:$0xff]  }
 0x171   :  { %2082 = vmatpush2.bf16.msra.mxu0 %v3113_v0  ;;  %v3166_v0 = vld [vmem:[#allocation2 + $0xb04] ss:$16 sps:$4 sm:$0xff]  }
 0x172   :  { %2083 = vmatprep.subr.bf16.mxu0 %v3120_v2  ;;  %v3169_v2 = vld [vmem:[#allocation2 + $0xce4] ss:$16 sps:$4 sm:$0xff]  }
 0x175   :  { %2084 = vmatpush2.bf16.msra.mxu0 %v3118_v3  ;;  %v3167_v3 = vld [vmem:[#allocation2 + $0xce0] ss:$16 sps:$4 sm:$0xff]  }
 0x176   :  { %2085 = vmatprep.subr.bf16.mxu0 %v3125_v7  ;;  %v3170_v7 = vld [vmem:[#allocation2 + $0xcc0] ss:$16 sps:$4 sm:$0xff]  }
 0x179   :  { %2086 = vmatpush2.bf16.msra.mxu0 %v3123_v8  ;;  %v3175_v8 = vld [vmem:[#allocation2 + $0xca4] ss:$16 sps:$4 sm:$0xff]  }
 0x17a   :  { %2087 = vmatprep.subr.bf16.mxu0 %v3130_v13  ;;  %v3176_v13 = vld [vmem:[#allocation2 + $0xc80] ss:$16 sps:$4 sm:$0xff]  }
 0x17c   :  { %v1259_v4 = vpop.f32.mrf.mxu0 }
 0x17d   :  { %v1302_v24 = vpop.f32.mrf.mxu1  ;;  %2088 = vmatpush2.bf16.msra.mxu0 %v3128_v20  ;;  %v1260_v38 = vadd.f32 %v1259_v4, %v1217_v31  ;;  %v3184_v20 = vld [vmem:[#allocation2 + $0xc44] ss:$16 sps:$4 sm:$0xff]   ;;  %v3194_v31 = vld [vmem:[#allocation2 + $0xd80] ss:$16 sps:$4 sm:$0xff]  }
 0x17e   :  { %v1261_v27 = vpop.f32.mrf.mxu0  ;;  %2089 = vmatprep.subr.bf16.mxu0 %v3135_v22  ;;  %v3187_v22 = vld [vmem:[#allocation2 + $0xc24] ss:$16 sps:$4 sm:$0xff]  }
 0x17f   :  { %v1304_v28 = vpop.f32.mrf.mxu1  ;;  %v1262_v30 = vadd.f32 %v1261_v27, %v1219_v25  ;;  %v3363_v49 = vadd.f32 %v1302_v24, %v1260_v38  ;;  %v3190_v4 = vld [vmem:[#allocation2 + $0xc04] ss:$16 sps:$4 sm:$0xff]   ;;  %v3188_v24 = vld [vmem:[#allocation2 + $0xc00] ss:$16 sps:$4 sm:$0xff]  }
 0x180   :  { %v1263_v32 = vpop.f32.mrf.mxu0 }
 0x181   :  { %v1306_v33 = vpop.f32.mrf.mxu1  ;;  %v1264_v35 = vadd.f32 %v1263_v32, %v1221_v14  ;;  %2090 = vmatpush2.bf16.msra.mxu0 %v3133_v26  ;;  %v1305_v42 = vadd.f32 %v1304_v28, %v1262_v30  ;;  %v1659_v26 = vmax.f32 %v3363_v49, 0.0  ;;  %v3191_v28 = vld [vmem:[#allocation2 + $0xde0] ss:$16 sps:$4 sm:$0xff]  }
 0x182   :  { %v1265_v41 = vpop.f32.mrf.mxu0  ;;  %2091 = vmatprep.subr.bf16.mxu0 %v3140_v29  ;;  %v3276_v29 = vmov 0.0   ;;  %v3192_v14 = vld [vmem:[#allocation2 + $0xdc0] ss:$16 sps:$4 sm:$0xff]  }
 0x183   :  { %v1266_v43 = vadd.f32 %v1265_v41, %v1223_v34  ;;  %v3361_v45 = vadd.f32 %v1306_v33, %v1264_v35  ;;  %v1308_v46 = vpop.f32.mrf.mxu1  ;;  %v1660_v50 = vmax.f32 %v1305_v42, 0.0  ;;  %v3193_v30 = vld [vmem:[#allocation2 + $0xda0] ss:$16 sps:$4 sm:$0xff]  }
 0x184   :  { %v3195_v32 = vld [vmem:[#allocation2 + $0xd60] ss:$16 sps:$4 sm:$0xff]  }
 0x185   :  { %v1309_v47 = vadd.f32 %v1308_v46, %v1266_v43  ;;  %2092 = vmatpush2.bf16.msra.mxu0 %v3138_v37  ;;  %v1313_v36 = vpack.c.bf16 %v3361_v45, %v3363_v49  ;;  %v1663_v25 = vmax.f32 %v3361_v45, 0.0  ;;  %v3196_v35 = vld [vmem:[#allocation2 + $0xd40] ss:$16 sps:$4 sm:$0xff]   ;;  %v1735_v49 = vsub.s32 2, %v3338_v12 }
 0x186   :  { %2769 = vmatprep.subr.bf16.mxu0 %v3276_v29  ;;  %v3197_v41 = vld [vmem:[#allocation2 + $0xd20] ss:$16 sps:$4 sm:$0xff]  }
 0x187   :  { %v1314_v5 = vpack.c.bf16 %v1309_v47, %v1305_v42  ;;  %v1664_v39 = vmax.f32 %v1309_v47, 0.0  ;;  %v1667_v27 = vpack.c.bf16 %v1663_v25, %v1659_v26  ;;  %v3198_v43 = vld [vmem:[#allocation2 + $0xd00] ss:$16 sps:$4 sm:$0xff]   ;;  %v2168_v26 = vsub.s32 3, %v3338_v12 }
 0x188   :  { %2094 = vmatmul.mubr.bf16.vlgmr.msra.gmra.mxu0 %v1665_v48  ;;  %v3200_v45 = vld [vmem:[#allocation2 + $0xec0] ss:$16 sps:$4 sm:$0xff]  }
 0x189   :  { %1648 = vmatprep.mubr.bf16.mxu1 %v1314_v5  ;;  %v1668_v54 = vpack.c.bf16 %v1664_v39, %v1660_v50  ;;  %2770 = vmatpush3.bf16.msra.mxu0 %v3191_v28  ;;  %v3201_v46 = vld [vmem:[#allocation2 + $0xea0] ss:$16 sps:$4 sm:$0xff]   ;;  %v1381_v50 = vsub.s32 1, %v3338_v12  ;;  %v1736_v5 = vrot.slane %v3345_v19, %v1735_v49 }
 0x18a   :  { %1649 = vmatmul.mubr.bf16.vlgmr.msra.gmra.mxu1 %v1313_v36  ;;  %2771 = vmatprep.subr.bf16.mxu0 %v3276_v29  ;;  %v3202_v47 = vld [vmem:[#allocation2 + $0xe80] ss:$16 sps:$4 sm:$0xff]  }
 0x18b   :  { %2105 = vmatpush1.bf16.msra.mxu1 %v3143_v52  ;;  %2136 = vmatprep.mubr.bf16.mxu1 %v1668_v54  ;;  %v3203_v48 = vld [vmem:[#allocation2 + $0xe60] ss:$16 sps:$4 sm:$0xff]   ;;  %v1382_v52 = vrot.slane %v3345_v19, %v1381_v50 }
 0x18c   :  { %2106 = vmatprep.subr.bf16.mxu1 %v3148_v53  ;;  %2785 = vmatprep.mubr.msk.bf16.mxu0 %vm3277_vm0, %v3276_v29  ;;  %v3206_v25 = vld [vmem:[#allocation2 + $0xe00] ss:$16 sps:$4 sm:$0xff]  }
 0x18d   :  { %2772 = vmatpush3.bf16.msra.mxu0 %v3192_v14 }
 0x18e   :  { %2773 = vmatprep.subr.bf16.mxu0 %v3276_v29 }
 0x18f   :  { %2107 = vmatpush1.bf16.msra.mxu1 %v3146_v40 }
 0x190   :  { %2108 = vmatprep.subr.bf16.mxu1 %v3151_v55 }
 0x191   :  { %2774 = vmatpush3.bf16.msra.mxu0 %v3193_v30 }
 0x192   :  { %2775 = vmatprep.subr.bf16.mxu0 %v3276_v29 }
 0x193   :  { %2109 = vmatpush1.bf16.msra.mxu1 %v3149_v56 }
 0x194   :  { %2110 = vmatprep.subr.bf16.mxu1 %v3154_v57 }
 0x195   :  { %2776 = vmatpush3.bf16.msra.mxu0 %v3194_v31 }
 0x196   :  { %2777 = vmatprep.subr.bf16.mxu0 %v3276_v29 }
 0x197   :  { %2111 = vmatpush1.bf16.msra.mxu1 %v3152_v58 }
 0x198   :  { %2112 = vmatprep.subr.bf16.mxu1 %v3157_v59 }
 0x199   :  { %2778 = vmatpush3.bf16.msra.mxu0 %v3195_v32 }
 0x19a   :  { %2779 = vmatprep.subr.bf16.mxu0 %v3276_v29 }
 0x19b   :  { %2113 = vmatpush1.bf16.msra.mxu1 %v3155_v51 }
 0x19c   :  { %2114 = vmatprep.subr.bf16.mxu1 %v3160_v60 }
 0x19d   :  { %2780 = vmatpush3.bf16.msra.mxu0 %v3196_v35 }
 0x19e   :  { %2781 = vmatprep.subr.bf16.mxu0 %v3276_v29 }
 0x19f   :  { %2115 = vmatpush1.bf16.msra.mxu1 %v3158_v61 }
 0x1a0   :  { %2116 = vmatprep.subr.bf16.mxu1 %v3163_v62 }
 0x1a1   :  { %2782 = vmatpush3.bf16.msra.mxu0 %v3197_v41 }
 0x1a2   :  { %2783 = vmatprep.subr.bf16.mxu0 %v3276_v29 }
 0x1a3   :  { %2117 = vmatpush1.bf16.msra.mxu1 %v3161_v63 }
 0x1a4   :  { %2118 = vmatprep.subr.bf16.mxu1 %v3166_v0  ;;  %v1740_v0 = vrot.slane %v3343_v17, %v1735_v49  ;;  %v3205_v17 = vld [vmem:[#allocation2 + $0xe20] ss:$16 sps:$4 sm:$0xff]  }
 0x1a5   :  { %2784 = vmatpush3.bf16.msra.mxu0 %v3198_v43 }
 0x1a7   :  { %2119 = vmatpush1.bf16.msra.mxu1 %v3164_v1 }
 0x1a8   :  { %2120 = vmatprep.subr.bf16.mxu1 %v3169_v2 }
 0x1ab   :  { %2121 = vmatpush2.bf16.msra.mxu1 %v3167_v3 }
 0x1ac   :  { %2122 = vmatprep.subr.bf16.mxu1 %v3172_v6 }
 0x1af   :  { %2123 = vmatpush2.bf16.msra.mxu1 %v3170_v7 }
 0x1b0   :  { %2124 = vmatprep.subr.bf16.mxu1 %v3175_v8 }
 0x1b3   :  { %2125 = vmatpush2.bf16.msra.mxu1 %v3173_v9 }
 0x1b4   :  { %2126 = vmatprep.subr.bf16.mxu1 %v3178_v11 }
 0x1b7   :  { %2127 = vmatpush2.bf16.msra.mxu1 %v3176_v13 }
 0x1b8   :  { %2128 = vmatprep.subr.bf16.mxu1 %v3181_v16 }
 0x1bb   :  { %2129 = vmatpush2.bf16.msra.mxu1 %v3179_v18 }
 0x1bc   :  { %2130 = vmatprep.subr.bf16.mxu1 %v3184_v20 }
 0x1bf   :  { %2131 = vmatpush2.bf16.msra.mxu1 %v3182_v21 }
 0x1c0   :  { %2132 = vmatprep.subr.bf16.mxu1 %v3187_v22 }
 0x1c3   :  { %2133 = vmatpush2.bf16.msra.mxu1 %v3185_v23 }
 0x1c4   :  { %2134 = vmatprep.subr.bf16.mxu1 %v3190_v4 }
 0x1c7   :  { %2135 = vmatpush2.bf16.msra.mxu1 %v3188_v24  ;;  %v3204_v24 = vld [vmem:[#allocation2 + $0xe40] ss:$16 sps:$4 sm:$0xff]  }
 0x1c8   :  { %2789 = vmatprep.subr.bf16.mxu1 %v3276_v29 }
 0x1ca   :  { %2137 = vmatmul.mubr.bf16.vlgmr.msra.gmra.mxu1 %v1667_v27  ;;  %v2169_v27 = vrot.slane %v3345_v19, %v2168_v26 }
 0x1cb   :  { %2805 = vmatprep.mubr.msk.bf16.mxu1 %vm3277_vm0, %v3276_v29  ;;  %2790 = vmatpush3.bf16.msra.mxu1 %v3199_v44 }
 0x1cc   :  { %2791 = vmatprep.subr.bf16.mxu1 %v3276_v29 }
 0x1cf   :  { %2792 = vmatpush3.bf16.msra.mxu1 %v3200_v45 }
 0x1d0   :  { %2793 = vmatprep.subr.bf16.mxu1 %v3276_v29 }
 0x1d3   :  { %2794 = vmatpush3.bf16.msra.mxu1 %v3201_v46 }
 0x1d4   :  { %2795 = vmatprep.subr.bf16.mxu1 %v3276_v29 }
 0x1d7   :  { %2796 = vmatpush3.bf16.msra.mxu1 %v3202_v47 }
 0x1d8   :  { %2797 = vmatprep.subr.bf16.mxu1 %v3276_v29 }
 0x1db   :  { %2798 = vmatpush3.bf16.msra.mxu1 %v3203_v48 }
 0x1dc   :  { %2799 = vmatprep.subr.bf16.mxu1 %v3276_v29 }
 0x1df   :  { %2800 = vmatpush3.bf16.msra.mxu1 %v3204_v24 }
 0x1e0   :  { %2801 = vmatprep.subr.bf16.mxu1 %v3276_v29 }
 0x1e3   :  { %2802 = vmatpush3.bf16.msra.mxu1 %v3205_v17 }
 0x1e4   :  { %2803 = vmatprep.subr.bf16.mxu1 %v3276_v29 }
 0x1e7   :  { %2804 = vmatpush3.bf16.msra.mxu1 %v3206_v25 }
 0x208   :  { %v2723_v33 = vpop.f32.mrf.mxu0 }
 0x20a   :  { %v2724_v34 = vpop.f32.mrf.mxu0 }
 0x20b   :  { %v2725_v37 = vadd.f32 %v2724_v34, %v2723_v33 }
 0x20c   :  { %v2726_v15 = vpop.f32.mrf.mxu0 }
 0x20d   :  { %v1610_v56 = vadd.f32 %v2725_v37, %v1382_v52 }
 0x20e   :  { %v2727_v38 = vpop.f32.mrf.mxu0 }
 0x20f   :  { %v2728_v42 = vadd.f32 %v2727_v38, %v2726_v15  ;;  %v2280_v15 = vsub.s32 4, %v3338_v12 }
 0x211   :  { %v1613_v61 = vadd.f32 %v2728_v42, %v1382_v52  ;;  %v2281_v29 = vrot.slane %v3345_v19, %v2280_v15 }
 0x248   :  { %v2095_v39 = vpop.f32.mrf.mxu0 }
 0x249   :  { %v2096_v36 = vadd.f32 %v2095_v39, %v1736_v5 }
 0x24a   :  { %v2097_v53 = vpop.f32.mrf.mxu0  ;;  %v2745_v54 = vpop.f32.mrf.mxu1 }
 0x24b   :  { %v2098_v7 = vadd.f32 %v2097_v53, %v1740_v0 }
 0x24c   :  { %v2099_v40 = vpop.f32.mrf.mxu0  ;;  %v2746_v55 = vpop.f32.mrf.mxu1 }
 0x24d   :  { %v2100_v57 = vadd.f32 %v2099_v40, %v1736_v5  ;;  %v2747_v58 = vadd.f32 %v2746_v55, %v2745_v54 }
 0x24e   :  { %v2748_v59 = vpop.f32.mrf.mxu1  ;;  %v2101_v3 = vpop.f32.mrf.mxu0 }
 0x24f   :  { %v1651_v51 = vadd.f32 %v2747_v58, %v1610_v56  ;;  %v2102_v11 = vadd.f32 %v2101_v3, %v1740_v0 }
 0x250   :  { %v2749_v60 = vpop.f32.mrf.mxu1 }
 0x251   :  { %v2750_v62 = vadd.f32 %v2749_v60, %v2748_v59  ;;  %v2376_v60 = vand.u32 127, %v211_v10 }
 0x253   :  { %v1654_v63 = vadd.f32 %v2750_v62, %v1613_v61  ;;  %vm2413_vm1 = vcmp.eq.s32.totalorder %v2376_v60, 1  ;;  %vm2414_vm2 = vcmp.eq.s32.totalorder %v2376_v60, 3  ;;  %vm2412_vm4 = vcmp.eq.s32.totalorder %v2376_v60, 2 }
 0x254   :  { %vm3397_vm3 = vmor %vm2413_vm1, %vm2414_vm2  ;;  %vm2411_vm5 = vcmp.eq.s32.totalorder %v2376_v60, 0 }
 0x28a   :  { %v2138_v1 = vpop.f32.mrf.mxu1 }
 0x28b   :  { %v2139_v2 = vadd.f32 %v2138_v1, %v2096_v36 }
 0x28c   :  { %v2140_v6 = vpop.f32.mrf.mxu1 }
 0x28d   :  { %v2371_v8 = vadd.f32 %v2139_v2, %v1651_v51  ;;  %v2141_v13 = vadd.f32 %v2140_v6, %v2098_v7 }
 0x28e   :  { %v2142_v9 = vpop.f32.mrf.mxu1 }
 0x28f   :  { %v2143_v16 = vadd.f32 %v2142_v9, %v2100_v57  ;;  %v2147_v22 = vmax.f32 %v2141_v13, 0.0 }
 0x290   :  { %v2144_v18 = vpop.f32.mrf.mxu1 }
 0x291   :  { %v2372_v20 = vadd.f32 %v2143_v16, %v1654_v63  ;;  %v2145_v21 = vadd.f32 %v2144_v18, %v2102_v11 }
 0x293   :  { %v2148_v23 = vmax.f32 %v2145_v21, 0.0 }
 0x295   :  { %v2149_v4 = vpack.c.bf16 %v2148_v23, %v2147_v22 }
 0x297   :  { %2786 = vmatmul.mubr.bf16.vlgmr.msra.gmra.mxu0 %v2149_v4 }
 0x357   :  { %v2252_v28 = vpop.f32.mrf.mxu0 }
 0x358   :  { %v2253_v30 = vadd.f32 %v2252_v28, %v2169_v27 }
 0x359   :  { %v2787_v14 = vpop.f32.mrf.mxu0 }
 0x35a   :  { %v2259_v34 = vmax.f32 %v2253_v30, 0.0 }
 0x35b   :  { %v2255_v31 = vpop.f32.mrf.mxu0 }
 0x35c   :  { %v2256_v32 = vadd.f32 %v2255_v31, %v2169_v27 }
 0x35d   :  { %v2788_v33 = vpop.f32.mrf.mxu0 }
 0x35e   :  { %v2260_v35 = vmax.f32 %v2256_v32, 0.0 }
 0x360   :  { %v2261_v37 = vpack.c.bf16 %v2260_v35, %v2259_v34 }
 0x362   :  { %2806 = vmatmul.mubr.bf16.vlgmr.msra.gmra.mxu1 %v2261_v37 }
 0x422   :  { %v2364_v38 = vpop.f32.mrf.mxu1 }
 0x423   :  { %v2365_v41 = vadd.f32 %v2364_v38, %v2281_v29 }
 0x424   :  { %v2807_v42 = vpop.f32.mrf.mxu1 }
 0x425   :  { %v2373_v43 = vadd.f32 %v2371_v8, %v2365_v41 }
 0x426   :  { %v2367_v44 = vpop.f32.mrf.mxu1 }
 0x427   :  { %v2377_v45 = vsub.f32 0.0, %v2373_v43  ;;  %v2393_v46 = vand.u32 2147483647, %v2373_v43  ;;  %v2368_v47 = vadd.f32 %v2367_v44, %v2281_v29  ;;  %v2391_v0 = vmax.f32 %v2373_v43, 0.0 }
 0x428   :  { %v2808_v48 = vpop.f32.mrf.mxu1 }
 0x429   :  { %v2379_v49 = vmul.f32 1.442695, %v2377_v45  ;;  %v2395_v50 = vsub.f32 0.0, %v2393_v46  ;;  %v2374_v5 = vadd.f32 %v2372_v20, %v2368_v47 }
 0x42b   :  { %3207 = vpow2.f32 %v2379_v49  ;;  %v2397_v39 = vmul.f32 1.442695, %v2395_v50  ;;  %v2378_v52 = vsub.f32 0.0, %v2374_v5  ;;  %v2394_v36 = vand.u32 2147483647, %v2374_v5 }
 0x42c   :  { %v2392_v16 = vmax.f32 %v2374_v5, 0.0 }
 0x42d   :  { %3209 = vpow2.f32 %v2397_v39  ;;  %v2381_v12 = vmul.f32 1.442695, %v2378_v52  ;;  %v2396_v53 = vsub.f32 0.0, %v2394_v36 }
 0x42f   :  { %3211 = vpow2.f32 %v2381_v12  ;;  %v2399_v19 = vmul.f32 1.442695, %v2396_v53 }
 0x431   :  { %3213 = vpow2.f32 %v2399_v19 }
 0x438   :  { %v3208_v54 = vpop.eup %3207 }
 0x439   :  { %v2383_v40 = vadd.f32 1.0, %v3208_v54 }
 0x43a   :  { %v3210_v55 = vpop.eup %3209 }
 0x43b   :  { %3215 = vrcp.f32 %v2383_v40  ;;  %v2401_v56 = vadd.f32 1.0, %v3210_v55 }
 0x43c   :  { %v3212_v57 = vpop.eup %3211 }
 0x43d   :  { %3217 = vlog2.f32 %v2401_v56  ;;  %v2384_v58 = vadd.f32 1.0, %v3212_v57 }
 0x43e   :  { %v3214_v59 = vpop.eup %3213 }
 0x43f   :  { %3219 = vrcp.f32 %v2384_v58  ;;  %v2402_v51 = vadd.f32 1.0, %v3214_v59 }
 0x440   :  { %3221 = vtanh.f32 %v2373_v43 }
 0x441   :  { %3223 = vlog2.f32 %v2402_v51 }
 0x442   :  { %3225 = vtanh.f32 %v2374_v5 }
 0x448   :  { %v3216_v61 = vpop.eup %3215 }
 0x449   :  { %v2387_v63 = vmax.f32 %v3216_v61, 0.0 }
 0x44a   :  { %v3218_v62 = vpop.eup %3217 }
 0x44b   :  { %v2404_v1 = vmul.f32 0.6931472, %v3218_v62  ;;  %v2389_v9 = vmin.f32 %v2387_v63, 1.0 }
 0x44c   :  { %v3220_v3 = vpop.eup %3219 }
 0x44d   :  { %v2407_v6 = vadd.f32 %v2404_v1, %v2391_v0  ;;  %v3222_v7 = vpop.eup %3221  ;;  %v2388_v13 = vmax.f32 %v3220_v3, 0.0 }
 0x44e   :  { %v3224_v8 = vpop.eup %3223 }
 0x44f   :  { %v2416_v10 = vsel %vm3397_vm3, %v2407_v6, 0.0  ;;  %v2406_v18 = vmul.f32 0.6931472, %v3224_v8  ;;  %v3226_v22 = vpop.eup %3225  ;;  %v2390_v23 = vmin.f32 %v2388_v13, 1.0 }
 0x450   :  { %v2418_v11 = vsel %vm2412_vm4, %v3222_v7, %v2416_v10 }
 0x451   :  { %v2420_v20 = vsel %vm2411_vm5, %v2389_v9, %v2418_v11  ;;  %v2408_v21 = vadd.f32 %v2406_v18, %v2392_v16 }
 0x452   :  { %2422 = vst [vmem:[%s3416_s3] sm:$0xff] %v2420_v20 }
 0x453   :  { %v2417_v4 = vsel %vm3397_vm3, %v2408_v21, 0.0 }
 0x454   :  { %v2419_v24 = vsel %vm2412_vm4, %v3226_v22, %v2417_v4 }
 0x455   :  { %v2421_v17 = vsel %vm2411_vm5, %v2390_v23, %v2419_v24 }
 0x456   :  { %2423 = vst [vmem:[%s3416_s3 + $0x8] sm:$0xff] %v2421_v17 }
 0x457   :  { %2428 = vsyncpa [#allocation3], 1 }
 0x458   :  { %2429 = vsyncpa [#allocation5], 1 }

</bundles_post_ra>
